<compile_context>
chip_gen: v5e
topology: v5e:2x2
jax: 0.10.0
libtpu: 0.0.40
codegen_flags: <defaults>
</compile_context>

<pallas_src>
import functools

import jax
import jax.numpy as jnp
from jax import lax
from jax.experimental import pallas as pl
from jax.experimental.pallas import tpu as pltpu


def _lstm_kernel(x_ref, wih_ref, whh_ref, b_ref, wout_ref, bout_ref,
                 out_ref, xp_ref, *, seq_len, batch, hidden):
    S, B, H = seq_len, batch, hidden

    # ---- Hoisted input projection (+ combined bias): one matmul covering all timesteps.
    #      (S*B, I) @ (I, 4H) + (1, 4H)  -> staged in VMEM scratch, read back per step.
    xp_ref[...] = (
        jnp.dot(x_ref[...], wih_ref[...], preferred_element_type=jnp.float32)
        + b_ref[...])

    # ---- Recurrence: fully unrolled, h/c carried as values (they fit in one vreg each).
    #      Static Python indices give aligned static slices of the staged projection.
    h = jnp.zeros((B, H), jnp.float32)
    c = jnp.zeros((B, H), jnp.float32)

    for t in range(S):
        gates = (xp_ref[pl.ds(t * B, B), :]
                 + jnp.dot(h, whh_ref[...], preferred_element_type=jnp.float32))
        # Gate columns were permuted in the wrapper to [i, f, o, g]:
        #   one wide tanh-based sigmoid slab (B, 3H) + one tanh (B, H).
        sig = 0.5 * (jnp.tanh(0.5 * gates[:, 0:3 * H]) + 1.0)
        i_g = sig[:, 0 * H:1 * H]
        f_g = sig[:, 1 * H:2 * H]
        o_g = sig[:, 2 * H:3 * H]
        g_g = jnp.tanh(gates[:, 3 * H:4 * H])
        c = f_g * c + i_g * g_g
        h = o_g * jnp.tanh(c)

    # ---- Final Linear (output_size == 1): VPU multiply + cross-lane reduction.
    #      Avoids an N=1 MXU matmul (1/256 of result width) and its masked narrow store.
    out_ref[...] = (jnp.sum(h * wout_ref[...], axis=-1, keepdims=True)
                    + bout_ref[...]).astype(out_ref.dtype)


def lstm_forward(x, w_ih, w_hh, b_ih, b_hh, w_out, b_out):
    """x: (S, B, I) f32. Returns (B, O) f32 == predictions[-1] of the PyTorch module."""
    S, B, I = x.shape
    H = w_ih.shape[0] // 4
    O = w_out.shape[0]
    assert O == 1, "module spec fixes output_size=1 (VPU-reduce finalize assumes O == 1)"

    # Permute PyTorch gate order [i, f, g, o] -> [i, f, o, g] so the three sigmoid gates form one
    # contiguous column slab in-kernel. Pure layout plumbing, runs once under XLA.
    perm = jnp.concatenate([jnp.arange(0, 2 * H),
                            jnp.arange(3 * H, 4 * H),
                            jnp.arange(2 * H, 3 * H)])
    wih_t = jnp.asarray(w_ih, jnp.float32)[perm, :].T              # (I, 4H)
    whh_t = jnp.asarray(w_hh, jnp.float32)[perm, :].T              # (H, 4H)
    b = (jnp.asarray(b_ih, jnp.float32)
         + jnp.asarray(b_hh, jnp.float32))[perm].reshape(1, 4 * H)  # (1, 4H)
    wout = jnp.asarray(w_out, jnp.float32).reshape(1, H)            # (1, H)
    bout = jnp.asarray(b_out, jnp.float32).reshape(1, O)            # (1, 1)

    x2 = jnp.asarray(x, jnp.float32).reshape(S * B, I)               # flatten time into rows

    kernel = functools.partial(_lstm_kernel, seq_len=S, batch=B, hidden=H)

    return pl.pallas_call(
        kernel,
        out_shape=jax.ShapeDtypeStruct((B, O), jnp.float32),
        grid_spec=pltpu.PrefetchScalarGridSpec(
            num_scalar_prefetch=0,
            grid=(1,),                                       # single invocation; loop lives in-kernel
            in_specs=[
                pl.BlockSpec((S * B, I), lambda i: (0, 0)),   # x (flattened, resident)
                pl.BlockSpec((I, 4 * H), lambda i: (0, 0)),   # W_ih^T (gate-permuted)
                pl.BlockSpec((H, 4 * H), lambda i: (0, 0)),   # W_hh^T (gate-permuted)
                pl.BlockSpec((1, 4 * H), lambda i: (0, 0)),   # b_ih + b_hh
                pl.BlockSpec((1, H), lambda i: (0, 0)),       # linear weight (row)
                pl.BlockSpec((1, O), lambda i: (0, 0)),       # linear bias
            ],
            out_specs=pl.BlockSpec((B, O), lambda i: (0, 0)),
            scratch_shapes=[
                pltpu.VMEM((S * B, 4 * H), jnp.float32),      # hoisted x-projection
            ],
        ),
        compiler_params=pltpu.CompilerParams(
            dimension_semantics=("arbitrary",),
        ),
    )(x2, wih_t, whh_t, b, wout, bout)


def lstm_reference(x, w_ih, w_hh, b_ih, b_hh, w_out, b_out):
    """Pure-JAX reference matching PyTorch nn.LSTM + Linear semantics (PyTorch gate order)."""
    S, B, I = x.shape
    H = w_hh.shape[1]

    def step(carry, x_t):
        h, c = carry
        gates = x_t @ w_ih.T + b_ih + h @ w_hh.T + b_hh
        i = jax.nn.sigmoid(gates[:, 0 * H:1 * H])
        f = jax.nn.sigmoid(gates[:, 1 * H:2 * H])
        g = jnp.tanh(gates[:, 2 * H:3 * H])
        o = jax.nn.sigmoid(gates[:, 3 * H:4 * H])
        c_new = f * c + i * g
        h_new = o * jnp.tanh(c_new)
        return (h_new, c_new), h_new

    h0 = jnp.zeros((B, H), jnp.float32)
    c0 = jnp.zeros((B, H), jnp.float32)
    (_, _), hs = lax.scan(step, (h0, c0), x)
    preds = hs.reshape(-1, H) @ w_out.T + b_out        # (S*B, O)
    preds = preds.reshape(S, B, -1)
    return preds[-1]                                    # (B, O)


if __name__ == "__main__":
    # Small, TPU-friendly shapes consistent with the module (input_size=4, output_size=1).
    SEQ, BATCH, INPUT, HIDDEN, OUT = 8, 8, 4, 128, 1

    key = jax.random.PRNGKey(0)
    ks = jax.random.split(key, 8)
    bound = 1.0 / jnp.sqrt(HIDDEN)

    x = jax.random.normal(ks[0], (SEQ, BATCH, INPUT), jnp.float32)
    w_ih = jax.random.uniform(ks[1], (4 * HIDDEN, INPUT), jnp.float32, -bound, bound)
    w_hh = jax.random.uniform(ks[2], (4 * HIDDEN, HIDDEN), jnp.float32, -bound, bound)
    b_ih = jax.random.uniform(ks[3], (4 * HIDDEN,), jnp.float32, -bound, bound)
    b_hh = jax.random.uniform(ks[4], (4 * HIDDEN,), jnp.float32, -bound, bound)
    w_out = jax.random.uniform(ks[5], (OUT, HIDDEN), jnp.float32, -bound, bound)
    b_out = jax.random.uniform(ks[6], (OUT,), jnp.float32, -bound, bound)

    out = lstm_forward(x, w_ih, w_hh, b_ih, b_hh, w_out, b_out)
    out = jax.block_until_ready(out)

    ref = lstm_reference(x, w_ih, w_hh, b_ih, b_hh, w_out, b_out)
    assert out.shape == (BATCH, OUT), out.shape
    assert jnp.allclose(out, ref, atol=1e-4, rtol=1e-4), (out, ref)

    print("KERNEL_OK")
</pallas_src>

<mosaic_0001>
module attributes {stable_mosaic.version = 11 : i64} {
  func.func @_lstm_kernel(%arg0: i32, %arg1: memref<64x4xf32, #tpu.memory_space<vmem>>, %arg2: memref<4x512xf32, #tpu.memory_space<vmem>>, %arg3: memref<128x512xf32, #tpu.memory_space<vmem>>, %arg4: memref<1x512xf32, #tpu.memory_space<vmem>>, %arg5: memref<1x128xf32, #tpu.memory_space<vmem>>, %arg6: memref<1x1xf32, #tpu.memory_space<vmem>>, %arg7: memref<8x1xf32, #tpu.memory_space<vmem>>, %arg8: memref<64x512xf32, #tpu.memory_space<vmem>>) attributes {dimension_semantics = [#tpu.dimension_semantics<arbitrary>], iteration_bounds = array<i64: 1>, scalar_prefetch = 0 : i64, scratch_operands = 1 : i64, tpu.core_type = #tpu.core_type<tc>, window_params = [{pipeline_mode = #tpu.pipeline_mode<synchronous>, transform_indices = @transform_0, window_bounds = array<i64: 64, 4>}, {pipeline_mode = #tpu.pipeline_mode<synchronous>, transform_indices = @transform_1, window_bounds = array<i64: 4, 512>}, {pipeline_mode = #tpu.pipeline_mode<synchronous>, transform_indices = @transform_2, window_bounds = array<i64: 128, 512>}, {pipeline_mode = #tpu.pipeline_mode<synchronous>, transform_indices = @transform_3, window_bounds = array<i64: 1, 512>}, {pipeline_mode = #tpu.pipeline_mode<synchronous>, transform_indices = @transform_4, window_bounds = array<i64: 1, 128>}, {pipeline_mode = #tpu.pipeline_mode<synchronous>, transform_indices = @transform_5, window_bounds = array<i64: 1, 1>}, {pipeline_mode = #tpu.pipeline_mode<synchronous>, transform_indices = @transform_6, window_bounds = array<i64: 8, 1>}]} {
    %c0 = arith.constant 0 : index
    %c0_0 = arith.constant 0 : index
    %0 = vector.load %arg1[%c0, %c0_0] : memref<64x4xf32, #tpu.memory_space<vmem>>, vector<64x4xf32>
    %c0_1 = arith.constant 0 : index
    %c0_2 = arith.constant 0 : index
    %1 = vector.load %arg2[%c0_1, %c0_2] : memref<4x512xf32, #tpu.memory_space<vmem>>, vector<4x512xf32>
    %cst = arith.constant dense<0.000000e+00> : vector<64x512xf32>
    %2 = tpu.matmul %0, %1, %cst {dimension_numbers = #tpu.dot_dimension_numbers<[1], [0], [0], [1], [0, 0, 1, 1], [], []>} : vector<64x4xf32>, vector<4x512xf32>, vector<64x512xf32> -> vector<64x512xf32>
    %c0_3 = arith.constant 0 : index
    %c0_4 = arith.constant 0 : index
    %3 = vector.load %arg4[%c0_3, %c0_4] : memref<1x512xf32, #tpu.memory_space<vmem>>, vector<1x512xf32>
    %4 = vector.broadcast %3 : vector<1x512xf32> to vector<64x512xf32>
    %5 = arith.addf %2, %4 : vector<64x512xf32>
    %c0_5 = arith.constant 0 : index
    %c0_6 = arith.constant 0 : index
    %6 = vector.load %arg8[%c0_5, %c0_6] : memref<64x512xf32, #tpu.memory_space<vmem>>, vector<64x512xf32>
    tpu.vector_store %arg8[%c0_5, %c0_6], %5 {strides = array<i32>} : memref<64x512xf32, #tpu.memory_space<vmem>>, vector<64x512xf32>,
    %cst_7 = arith.constant 0.000000e+00 : f32
    %7 = vector.broadcast %cst_7 : f32 to vector<8x128xf32>
    %cst_8 = arith.constant 0.000000e+00 : f32
    %8 = vector.broadcast %cst_8 : f32 to vector<8x128xf32>
    %c0_9 = arith.constant 0 : index
    %c0_10 = arith.constant 0 : index
    %9 = vector.load %arg8[%c0_9, %c0_10] : memref<64x512xf32, #tpu.memory_space<vmem>>, vector<8x512xf32>
    %c0_11 = arith.constant 0 : index
    %c0_12 = arith.constant 0 : index
    %10 = vector.load %arg3[%c0_11, %c0_12] : memref<128x512xf32, #tpu.memory_space<vmem>>, vector<128x512xf32>
    %cst_13 = arith.constant dense<0.000000e+00> : vector<8x512xf32>
    %11 = tpu.matmul %7, %10, %cst_13 {dimension_numbers = #tpu.dot_dimension_numbers<[1], [0], [0], [1], [0, 0, 1, 1], [], []>} : vector<8x128xf32>, vector<128x512xf32>, vector<8x512xf32> -> vector<8x512xf32>
    %12 = arith.addf %9, %11 : vector<8x512xf32>
    %13 = vector.extract_strided_slice %12 {offsets = [0, 0], sizes = [8, 384], strides = [1, 1]} : vector<8x512xf32> to vector<8x384xf32>
    %cst_14 = arith.constant 5.000000e-01 : f32
    %14 = vector.broadcast %cst_14 : f32 to vector<8x384xf32>
    %15 = arith.mulf %14, %13 : vector<8x384xf32>
    %16 = math.tanh %15 : vector<8x384xf32>
    %cst_15 = arith.constant 1.000000e+00 : f32
    %17 = vector.broadcast %cst_15 : f32 to vector<8x384xf32>
    %18 = arith.addf %16, %17 : vector<8x384xf32>
    %cst_16 = arith.constant 5.000000e-01 : f32
    %19 = vector.broadcast %cst_16 : f32 to vector<8x384xf32>
    %20 = arith.mulf %19, %18 : vector<8x384xf32>
    %21 = vector.extract_strided_slice %20 {offsets = [0, 0], sizes = [8, 128], strides = [1, 1]} : vector<8x384xf32> to vector<8x128xf32>
    %22 = vector.extract_strided_slice %20 {offsets = [0, 128], sizes = [8, 128], strides = [1, 1]} : vector<8x384xf32> to vector<8x128xf32>
    %23 = vector.extract_strided_slice %20 {offsets = [0, 256], sizes = [8, 128], strides = [1, 1]} : vector<8x384xf32> to vector<8x128xf32>
    %24 = vector.extract_strided_slice %12 {offsets = [0, 384], sizes = [8, 128], strides = [1, 1]} : vector<8x512xf32> to vector<8x128xf32>
    %25 = math.tanh %24 : vector<8x128xf32>
    %26 = arith.mulf %22, %8 : vector<8x128xf32>
    %27 = arith.mulf %21, %25 : vector<8x128xf32>
    %28 = arith.addf %26, %27 : vector<8x128xf32>
    %29 = math.tanh %28 : vector<8x128xf32>
    %30 = arith.mulf %23, %29 : vector<8x128xf32>
    %c8 = arith.constant 8 : index
    %c0_17 = arith.constant 0 : index
    %31 = vector.load %arg8[%c8, %c0_17] : memref<64x512xf32, #tpu.memory_space<vmem>>, vector<8x512xf32>
    %c0_18 = arith.constant 0 : index
    %c0_19 = arith.constant 0 : index
    %32 = vector.load %arg3[%c0_18, %c0_19] : memref<128x512xf32, #tpu.memory_space<vmem>>, vector<128x512xf32>
    %cst_20 = arith.constant dense<0.000000e+00> : vector<8x512xf32>
    %33 = tpu.matmul %30, %32, %cst_20 {dimension_numbers = #tpu.dot_dimension_numbers<[1], [0], [0], [1], [0, 0, 1, 1], [], []>} : vector<8x128xf32>, vector<128x512xf32>, vector<8x512xf32> -> vector<8x512xf32>
    %34 = arith.addf %31, %33 : vector<8x512xf32>
    %35 = vector.extract_strided_slice %34 {offsets = [0, 0], sizes = [8, 384], strides = [1, 1]} : vector<8x512xf32> to vector<8x384xf32>
    %cst_21 = arith.constant 5.000000e-01 : f32
    %36 = vector.broadcast %cst_21 : f32 to vector<8x384xf32>
    %37 = arith.mulf %36, %35 : vector<8x384xf32>
    %38 = math.tanh %37 : vector<8x384xf32>
    %cst_22 = arith.constant 1.000000e+00 : f32
    %39 = vector.broadcast %cst_22 : f32 to vector<8x384xf32>
    %40 = arith.addf %38, %39 : vector<8x384xf32>
    %cst_23 = arith.constant 5.000000e-01 : f32
    %41 = vector.broadcast %cst_23 : f32 to vector<8x384xf32>
    %42 = arith.mulf %41, %40 : vector<8x384xf32>
    %43 = vector.extract_strided_slice %42 {offsets = [0, 0], sizes = [8, 128], strides = [1, 1]} : vector<8x384xf32> to vector<8x128xf32>
    %44 = vector.extract_strided_slice %42 {offsets = [0, 128], sizes = [8, 128], strides = [1, 1]} : vector<8x384xf32> to vector<8x128xf32>
    %45 = vector.extract_strided_slice %42 {offsets = [0, 256], sizes = [8, 128], strides = [1, 1]} : vector<8x384xf32> to vector<8x128xf32>
    %46 = vector.extract_strided_slice %34 {offsets = [0, 384], sizes = [8, 128], strides = [1, 1]} : vector<8x512xf32> to vector<8x128xf32>
    %47 = math.tanh %46 : vector<8x128xf32>
    %48 = arith.mulf %44, %28 : vector<8x128xf32>
    %49 = arith.mulf %43, %47 : vector<8x128xf32>
    %50 = arith.addf %48, %49 : vector<8x128xf32>
    %51 = math.tanh %50 : vector<8x128xf32>
    %52 = arith.mulf %45, %51 : vector<8x128xf32>
    %c16 = arith.constant 16 : index
    %c0_24 = arith.constant 0 : index
    %53 = vector.load %arg8[%c16, %c0_24] : memref<64x512xf32, #tpu.memory_space<vmem>>, vector<8x512xf32>
    %c0_25 = arith.constant 0 : index
    %c0_26 = arith.constant 0 : index
    %54 = vector.load %arg3[%c0_25, %c0_26] : memref<128x512xf32, #tpu.memory_space<vmem>>, vector<128x512xf32>
    %cst_27 = arith.constant dense<0.000000e+00> : vector<8x512xf32>
    %55 = tpu.matmul %52, %54, %cst_27 {dimension_numbers = #tpu.dot_dimension_numbers<[1], [0], [0], [1], [0, 0, 1, 1], [], []>} : vector<8x128xf32>, vector<128x512xf32>, vector<8x512xf32> -> vector<8x512xf32>
    %56 = arith.addf %53, %55 : vector<8x512xf32>
    %57 = vector.extract_strided_slice %56 {offsets = [0, 0], sizes = [8, 384], strides = [1, 1]} : vector<8x512xf32> to vector<8x384xf32>
    %cst_28 = arith.constant 5.000000e-01 : f32
    %58 = vector.broadcast %cst_28 : f32 to vector<8x384xf32>
    %59 = arith.mulf %58, %57 : vector<8x384xf32>
    %60 = math.tanh %59 : vector<8x384xf32>
    %cst_29 = arith.constant 1.000000e+00 : f32
    %61 = vector.broadcast %cst_29 : f32 to vector<8x384xf32>
    %62 = arith.addf %60, %61 : vector<8x384xf32>
    %cst_30 = arith.constant 5.000000e-01 : f32
    %63 = vector.broadcast %cst_30 : f32 to vector<8x384xf32>
    %64 = arith.mulf %63, %62 : vector<8x384xf32>
    %65 = vector.extract_strided_slice %64 {offsets = [0, 0], sizes = [8, 128], strides = [1, 1]} : vector<8x384xf32> to vector<8x128xf32>
    %66 = vector.extract_strided_slice %64 {offsets = [0, 128], sizes = [8, 128], strides = [1, 1]} : vector<8x384xf32> to vector<8x128xf32>
    %67 = vector.extract_strided_slice %64 {offsets = [0, 256], sizes = [8, 128], strides = [1, 1]} : vector<8x384xf32> to vector<8x128xf32>
    %68 = vector.extract_strided_slice %56 {offsets = [0, 384], sizes = [8, 128], strides = [1, 1]} : vector<8x512xf32> to vector<8x128xf32>
    %69 = math.tanh %68 : vector<8x128xf32>
    %70 = arith.mulf %66, %50 : vector<8x128xf32>
    %71 = arith.mulf %65, %69 : vector<8x128xf32>
    %72 = arith.addf %70, %71 : vector<8x128xf32>
    %73 = math.tanh %72 : vector<8x128xf32>
    %74 = arith.mulf %67, %73 : vector<8x128xf32>
    %c24 = arith.constant 24 : index
    %c0_31 = arith.constant 0 : index
    %75 = vector.load %arg8[%c24, %c0_31] : memref<64x512xf32, #tpu.memory_space<vmem>>, vector<8x512xf32>
    %c0_32 = arith.constant 0 : index
    %c0_33 = arith.constant 0 : index
    %76 = vector.load %arg3[%c0_32, %c0_33] : memref<128x512xf32, #tpu.memory_space<vmem>>, vector<128x512xf32>
    %cst_34 = arith.constant dense<0.000000e+00> : vector<8x512xf32>
    %77 = tpu.matmul %74, %76, %cst_34 {dimension_numbers = #tpu.dot_dimension_numbers<[1], [0], [0], [1], [0, 0, 1, 1], [], []>} : vector<8x128xf32>, vector<128x512xf32>, vector<8x512xf32> -> vector<8x512xf32>
    %78 = arith.addf %75, %77 : vector<8x512xf32>
    %79 = vector.extract_strided_slice %78 {offsets = [0, 0], sizes = [8, 384], strides = [1, 1]} : vector<8x512xf32> to vector<8x384xf32>
    %cst_35 = arith.constant 5.000000e-01 : f32
    %80 = vector.broadcast %cst_35 : f32 to vector<8x384xf32>
    %81 = arith.mulf %80, %79 : vector<8x384xf32>
    %82 = math.tanh %81 : vector<8x384xf32>
    %cst_36 = arith.constant 1.000000e+00 : f32
    %83 = vector.broadcast %cst_36 : f32 to vector<8x384xf32>
    %84 = arith.addf %82, %83 : vector<8x384xf32>
    %cst_37 = arith.constant 5.000000e-01 : f32
    %85 = vector.broadcast %cst_37 : f32 to vector<8x384xf32>
    %86 = arith.mulf %85, %84 : vector<8x384xf32>
    %87 = vector.extract_strided_slice %86 {offsets = [0, 0], sizes = [8, 128], strides = [1, 1]} : vector<8x384xf32> to vector<8x128xf32>
    %88 = vector.extract_strided_slice %86 {offsets = [0, 128], sizes = [8, 128], strides = [1, 1]} : vector<8x384xf32> to vector<8x128xf32>
    %89 = vector.extract_strided_slice %86 {offsets = [0, 256], sizes = [8, 128], strides = [1, 1]} : vector<8x384xf32> to vector<8x128xf32>
    %90 = vector.extract_strided_slice %78 {offsets = [0, 384], sizes = [8, 128], strides = [1, 1]} : vector<8x512xf32> to vector<8x128xf32>
    %91 = math.tanh %90 : vector<8x128xf32>
    %92 = arith.mulf %88, %72 : vector<8x128xf32>
    %93 = arith.mulf %87, %91 : vector<8x128xf32>
    %94 = arith.addf %92, %93 : vector<8x128xf32>
    %95 = math.tanh %94 : vector<8x128xf32>
    %96 = arith.mulf %89, %95 : vector<8x128xf32>
    %c32 = arith.constant 32 : index
    %c0_38 = arith.constant 0 : index
    %97 = vector.load %arg8[%c32, %c0_38] : memref<64x512xf32, #tpu.memory_space<vmem>>, vector<8x512xf32>
    %c0_39 = arith.constant 0 : index
    %c0_40 = arith.constant 0 : index
    %98 = vector.load %arg3[%c0_39, %c0_40] : memref<128x512xf32, #tpu.memory_space<vmem>>, vector<128x512xf32>
    %cst_41 = arith.constant dense<0.000000e+00> : vector<8x512xf32>
    %99 = tpu.matmul %96, %98, %cst_41 {dimension_numbers = #tpu.dot_dimension_numbers<[1], [0], [0], [1], [0, 0, 1, 1], [], []>} : vector<8x128xf32>, vector<128x512xf32>, vector<8x512xf32> -> vector<8x512xf32>
    %100 = arith.addf %97, %99 : vector<8x512xf32>
    %101 = vector.extract_strided_slice %100 {offsets = [0, 0], sizes = [8, 384], strides = [1, 1]} : vector<8x512xf32> to vector<8x384xf32>
    %cst_42 = arith.constant 5.000000e-01 : f32
    %102 = vector.broadcast %cst_42 : f32 to vector<8x384xf32>
    %103 = arith.mulf %102, %101 : vector<8x384xf32>
    %104 = math.tanh %103 : vector<8x384xf32>
    %cst_43 = arith.constant 1.000000e+00 : f32
    %105 = vector.broadcast %cst_43 : f32 to vector<8x384xf32>
    %106 = arith.addf %104, %105 : vector<8x384xf32>
    %cst_44 = arith.constant 5.000000e-01 : f32
    %107 = vector.broadcast %cst_44 : f32 to vector<8x384xf32>
    %108 = arith.mulf %107, %106 : vector<8x384xf32>
    %109 = vector.extract_strided_slice %108 {offsets = [0, 0], sizes = [8, 128], strides = [1, 1]} : vector<8x384xf32> to vector<8x128xf32>
    %110 = vector.extract_strided_slice %108 {offsets = [0, 128], sizes = [8, 128], strides = [1, 1]} : vector<8x384xf32> to vector<8x128xf32>
    %111 = vector.extract_strided_slice %108 {offsets = [0, 256], sizes = [8, 128], strides = [1, 1]} : vector<8x384xf32> to vector<8x128xf32>
    %112 = vector.extract_strided_slice %100 {offsets = [0, 384], sizes = [8, 128], strides = [1, 1]} : vector<8x512xf32> to vector<8x128xf32>
    %113 = math.tanh %112 : vector<8x128xf32>
    %114 = arith.mulf %110, %94 : vector<8x128xf32>
    %115 = arith.mulf %109, %113 : vector<8x128xf32>
    %116 = arith.addf %114, %115 : vector<8x128xf32>
    %117 = math.tanh %116 : vector<8x128xf32>
    %118 = arith.mulf %111, %117 : vector<8x128xf32>
    %c40 = arith.constant 40 : index
    %c0_45 = arith.constant 0 : index
    %119 = vector.load %arg8[%c40, %c0_45] : memref<64x512xf32, #tpu.memory_space<vmem>>, vector<8x512xf32>
    %c0_46 = arith.constant 0 : index
    %c0_47 = arith.constant 0 : index
    %120 = vector.load %arg3[%c0_46, %c0_47] : memref<128x512xf32, #tpu.memory_space<vmem>>, vector<128x512xf32>
    %cst_48 = arith.constant dense<0.000000e+00> : vector<8x512xf32>
    %121 = tpu.matmul %118, %120, %cst_48 {dimension_numbers = #tpu.dot_dimension_numbers<[1], [0], [0], [1], [0, 0, 1, 1], [], []>} : vector<8x128xf32>, vector<128x512xf32>, vector<8x512xf32> -> vector<8x512xf32>
    %122 = arith.addf %119, %121 : vector<8x512xf32>
    %123 = vector.extract_strided_slice %122 {offsets = [0, 0], sizes = [8, 384], strides = [1, 1]} : vector<8x512xf32> to vector<8x384xf32>
    %cst_49 = arith.constant 5.000000e-01 : f32
    %124 = vector.broadcast %cst_49 : f32 to vector<8x384xf32>
    %125 = arith.mulf %124, %123 : vector<8x384xf32>
    %126 = math.tanh %125 : vector<8x384xf32>
    %cst_50 = arith.constant 1.000000e+00 : f32
    %127 = vector.broadcast %cst_50 : f32 to vector<8x384xf32>
    %128 = arith.addf %126, %127 : vector<8x384xf32>
    %cst_51 = arith.constant 5.000000e-01 : f32
    %129 = vector.broadcast %cst_51 : f32 to vector<8x384xf32>
    %130 = arith.mulf %129, %128 : vector<8x384xf32>
    %131 = vector.extract_strided_slice %130 {offsets = [0, 0], sizes = [8, 128], strides = [1, 1]} : vector<8x384xf32> to vector<8x128xf32>
    %132 = vector.extract_strided_slice %130 {offsets = [0, 128], sizes = [8, 128], strides = [1, 1]} : vector<8x384xf32> to vector<8x128xf32>
    %133 = vector.extract_strided_slice %130 {offsets = [0, 256], sizes = [8, 128], strides = [1, 1]} : vector<8x384xf32> to vector<8x128xf32>
    %134 = vector.extract_strided_slice %122 {offsets = [0, 384], sizes = [8, 128], strides = [1, 1]} : vector<8x512xf32> to vector<8x128xf32>
    %135 = math.tanh %134 : vector<8x128xf32>
    %136 = arith.mulf %132, %116 : vector<8x128xf32>
    %137 = arith.mulf %131, %135 : vector<8x128xf32>
    %138 = arith.addf %136, %137 : vector<8x128xf32>
    %139 = math.tanh %138 : vector<8x128xf32>
    %140 = arith.mulf %133, %139 : vector<8x128xf32>
    %c48 = arith.constant 48 : index
    %c0_52 = arith.constant 0 : index
    %141 = vector.load %arg8[%c48, %c0_52] : memref<64x512xf32, #tpu.memory_space<vmem>>, vector<8x512xf32>
    %c0_53 = arith.constant 0 : index
    %c0_54 = arith.constant 0 : index
    %142 = vector.load %arg3[%c0_53, %c0_54] : memref<128x512xf32, #tpu.memory_space<vmem>>, vector<128x512xf32>
    %cst_55 = arith.constant dense<0.000000e+00> : vector<8x512xf32>
    %143 = tpu.matmul %140, %142, %cst_55 {dimension_numbers = #tpu.dot_dimension_numbers<[1], [0], [0], [1], [0, 0, 1, 1], [], []>} : vector<8x128xf32>, vector<128x512xf32>, vector<8x512xf32> -> vector<8x512xf32>
    %144 = arith.addf %141, %143 : vector<8x512xf32>
    %145 = vector.extract_strided_slice %144 {offsets = [0, 0], sizes = [8, 384], strides = [1, 1]} : vector<8x512xf32> to vector<8x384xf32>
    %cst_56 = arith.constant 5.000000e-01 : f32
    %146 = vector.broadcast %cst_56 : f32 to vector<8x384xf32>
    %147 = arith.mulf %146, %145 : vector<8x384xf32>
    %148 = math.tanh %147 : vector<8x384xf32>
    %cst_57 = arith.constant 1.000000e+00 : f32
    %149 = vector.broadcast %cst_57 : f32 to vector<8x384xf32>
    %150 = arith.addf %148, %149 : vector<8x384xf32>
    %cst_58 = arith.constant 5.000000e-01 : f32
    %151 = vector.broadcast %cst_58 : f32 to vector<8x384xf32>
    %152 = arith.mulf %151, %150 : vector<8x384xf32>
    %153 = vector.extract_strided_slice %152 {offsets = [0, 0], sizes = [8, 128], strides = [1, 1]} : vector<8x384xf32> to vector<8x128xf32>
    %154 = vector.extract_strided_slice %152 {offsets = [0, 128], sizes = [8, 128], strides = [1, 1]} : vector<8x384xf32> to vector<8x128xf32>
    %155 = vector.extract_strided_slice %152 {offsets = [0, 256], sizes = [8, 128], strides = [1, 1]} : vector<8x384xf32> to vector<8x128xf32>
    %156 = vector.extract_strided_slice %144 {offsets = [0, 384], sizes = [8, 128], strides = [1, 1]} : vector<8x512xf32> to vector<8x128xf32>
    %157 = math.tanh %156 : vector<8x128xf32>
    %158 = arith.mulf %154, %138 : vector<8x128xf32>
    %159 = arith.mulf %153, %157 : vector<8x128xf32>
    %160 = arith.addf %158, %159 : vector<8x128xf32>
    %161 = math.tanh %160 : vector<8x128xf32>
    %162 = arith.mulf %155, %161 : vector<8x128xf32>
    %c56 = arith.constant 56 : index
    %c0_59 = arith.constant 0 : index
    %163 = vector.load %arg8[%c56, %c0_59] : memref<64x512xf32, #tpu.memory_space<vmem>>, vector<8x512xf32>
    %c0_60 = arith.constant 0 : index
    %c0_61 = arith.constant 0 : index
    %164 = vector.load %arg3[%c0_60, %c0_61] : memref<128x512xf32, #tpu.memory_space<vmem>>, vector<128x512xf32>
    %cst_62 = arith.constant dense<0.000000e+00> : vector<8x512xf32>
    %165 = tpu.matmul %162, %164, %cst_62 {dimension_numbers = #tpu.dot_dimension_numbers<[1], [0], [0], [1], [0, 0, 1, 1], [], []>} : vector<8x128xf32>, vector<128x512xf32>, vector<8x512xf32> -> vector<8x512xf32>
    %166 = arith.addf %163, %165 : vector<8x512xf32>
    %167 = vector.extract_strided_slice %166 {offsets = [0, 0], sizes = [8, 384], strides = [1, 1]} : vector<8x512xf32> to vector<8x384xf32>
    %cst_63 = arith.constant 5.000000e-01 : f32
    %168 = vector.broadcast %cst_63 : f32 to vector<8x384xf32>
    %169 = arith.mulf %168, %167 : vector<8x384xf32>
    %170 = math.tanh %169 : vector<8x384xf32>
    %cst_64 = arith.constant 1.000000e+00 : f32
    %171 = vector.broadcast %cst_64 : f32 to vector<8x384xf32>
    %172 = arith.addf %170, %171 : vector<8x384xf32>
    %cst_65 = arith.constant 5.000000e-01 : f32
    %173 = vector.broadcast %cst_65 : f32 to vector<8x384xf32>
    %174 = arith.mulf %173, %172 : vector<8x384xf32>
    %175 = vector.extract_strided_slice %174 {offsets = [0, 0], sizes = [8, 128], strides = [1, 1]} : vector<8x384xf32> to vector<8x128xf32>
    %176 = vector.extract_strided_slice %174 {offsets = [0, 128], sizes = [8, 128], strides = [1, 1]} : vector<8x384xf32> to vector<8x128xf32>
    %177 = vector.extract_strided_slice %174 {offsets = [0, 256], sizes = [8, 128], strides = [1, 1]} : vector<8x384xf32> to vector<8x128xf32>
    %178 = vector.extract_strided_slice %166 {offsets = [0, 384], sizes = [8, 128], strides = [1, 1]} : vector<8x512xf32> to vector<8x128xf32>
    %179 = math.tanh %178 : vector<8x128xf32>
    %180 = arith.mulf %176, %160 : vector<8x128xf32>
    %181 = arith.mulf %175, %179 : vector<8x128xf32>
    %182 = arith.addf %180, %181 : vector<8x128xf32>
    %183 = math.tanh %182 : vector<8x128xf32>
    %184 = arith.mulf %177, %183 : vector<8x128xf32>
    %c0_66 = arith.constant 0 : index
    %c0_67 = arith.constant 0 : index
    %185 = vector.load %arg5[%c0_66, %c0_67] : memref<1x128xf32, #tpu.memory_space<vmem>>, vector<1x128xf32>
    %186 = vector.broadcast %185 : vector<1x128xf32> to vector<8x128xf32>
    %187 = arith.mulf %184, %186 : vector<8x128xf32>
    %cst_68 = arith.constant dense<0.000000e+00> : vector<8xf32>
    %188 = vector.multi_reduction <add>, %187, %cst_68 [1] : vector<8x128xf32> to vector<8xf32>
    %189 = vector.shape_cast %188 : vector<8xf32> to vector<8x1xf32>
    %c0_69 = arith.constant 0 : index
    %c0_70 = arith.constant 0 : index
    %190 = vector.load %arg6[%c0_69, %c0_70] : memref<1x1xf32, #tpu.memory_space<vmem>>, vector<1x1xf32>
    %191 = vector.broadcast %190 : vector<1x1xf32> to vector<8x1xf32>
    %192 = arith.addf %189, %191 : vector<8x1xf32>
    %c0_71 = arith.constant 0 : index
    %c0_72 = arith.constant 0 : index
    %193 = vector.load %arg7[%c0_71, %c0_72] : memref<8x1xf32, #tpu.memory_space<vmem>>, vector<8x1xf32>
    tpu.vector_store %arg7[%c0_71, %c0_72], %192 {strides = array<i32>} : memref<8x1xf32, #tpu.memory_space<vmem>>, vector<8x1xf32>,
    return
  }
  func.func @transform_0(%arg0: i32) -> (i32, i32) {
    %c0_i32 = arith.constant 0 : i32
    %c0_i32_0 = arith.constant 0 : i32
    %c0_i32_1 = arith.constant 0 : i32
    return %c0_i32, %c0_i32_0 : i32, i32
  }
  func.func @transform_1(%arg0: i32) -> (i32, i32) {
    %c0_i32 = arith.constant 0 : i32
    %c0_i32_0 = arith.constant 0 : i32
    %c0_i32_1 = arith.constant 0 : i32
    return %c0_i32, %c0_i32_0 : i32, i32
  }
  func.func @transform_2(%arg0: i32) -> (i32, i32) {
    %c0_i32 = arith.constant 0 : i32
    %c0_i32_0 = arith.constant 0 : i32
    %c0_i32_1 = arith.constant 0 : i32
    return %c0_i32, %c0_i32_0 : i32, i32
  }
  func.func @transform_3(%arg0: i32) -> (i32, i32) {
    %c0_i32 = arith.constant 0 : i32
    %c0_i32_0 = arith.constant 0 : i32
    %c0_i32_1 = arith.constant 0 : i32
    return %c0_i32, %c0_i32_0 : i32, i32
  }
  func.func @transform_4(%arg0: i32) -> (i32, i32) {
    %c0_i32 = arith.constant 0 : i32
    %c0_i32_0 = arith.constant 0 : i32
    %c0_i32_1 = arith.constant 0 : i32
    return %c0_i32, %c0_i32_0 : i32, i32
  }
  func.func @transform_5(%arg0: i32) -> (i32, i32) {
    %c0_i32 = arith.constant 0 : i32
    %c0_i32_0 = arith.constant 0 : i32
    %c0_i32_1 = arith.constant 0 : i32
    return %c0_i32, %c0_i32_0 : i32, i32
  }
  func.func @transform_6(%arg0: i32) -> (i32, i32) {
    %c0_i32 = arith.constant 0 : i32
    %c0_i32_0 = arith.constant 0 : i32
    %c0_i32_1 = arith.constant 0 : i32
    return %c0_i32, %c0_i32_0 : i32, i32
  }
}

</mosaic_0001>

<bundles_post_ra>
// kernel: tpu_custom_call.1
= control target key start
LH: loop header
LB: loop body
LE: loop exit
PB: predicated region body
PF: predicated region fallthrough
CT: control target
= control target key end

     0   :  { %s2457_s0 = inlined_call_operand.vmem [shape: f32[64,4], index: 0, kind: input, shape index: {}]   ;;  %s2458_s1 = inlined_call_operand.vmem [shape: f32[4,512], index: 1, kind: input, shape index: {}]   ;;  %s2459_s2 = inlined_call_operand.hbm [shape: f32[128,512], index: 2, kind: input, shape index: {}]   ;;  %s2460_s3 = inlined_call_operand.vmem [shape: f32[1,512], index: 3, kind: input, shape index: {}]   ;;  %s2461_s4 = inlined_call_operand.vmem [shape: f32[1,128], index: 4, kind: input, shape index: {}]   ;;  %s2462_s5 = inlined_call_operand.<no memory space> [shape: f32[1,1], index: 5, kind: input, shape index: {}]   ;;  %s2463_s6 = inlined_call_operand.vmem [shape: f32[8,1], index: 6, kind: output, shape index: {}]  }
   0x1   :  { %v11_v0 = vstv %s2462_s5 }
   0x2   :  { %12 = vst [vmem:[#allocation3] sm:$0x1] %v11_v0 }
   0x3   :  { %13 = vsyncpa [#allocation5], 0  ;;  %s22_s25 = sshll.u32 %s2459_s2, 4  ;;  %s1443_s26 = smov [#allocation4]   ;;  %s23_s25 = int_to_ptr.hbm [resolvable:$true] %s22_s25 }
   0x4   :  { %s24_s27 = sshll.u32 %s1443_s26, 4  ;;  %s1444_s28 = smov 512   ;;  %s25_s27 = int_to_ptr.vmem [resolvable:$true] %s24_s27 }
   0x5   :  { %s1445_s29 = smov 32  }
   0x6   :  { %30 = dma.hbm_to_vmem [thread:$0]  %s23_s25, 8192, %s25_s27, [#allocation5], %s1444_s28, %s1444_s28, %s1445_s29  }
   0x7   :  { %1441 = dma.done.wait [#allocation5], 8192  }
   0x8   :  { %1442 = vsyncadd [#allocation5], 4294959104  ;;  %v49_v1 = vld [vmem:[%s2458_s1] sm:$0xff]  ;;  %v50_v2 = vld [vmem:[%s2458_s1 + $0x8] sm:$0xff]  ;;  %vm95_vm0 = vcmask 1043456   ;;  %vm70_vm1 = vcmask 31744  }
   0x9   :  { %63 = vst [vmem:[#allocation1] ss:$2 sm:$0xff] %v49_v1  ;;  %v41_v3 = vld [vmem:[%s2457_s0] sm:$0xff]  ;;  %v1497_v8 = vld [vmem:[#allocation4 + $0x1e0] sm:$0xff]  ;;  %v1499_v9 = vld [vmem:[#allocation4 + $0x1e8] sm:$0xff]  ;;  %vm1224_vm2 = vcmask 7168  }
   0xa   :  { %65 = vst [vmem:[#allocation1 + $0x10] ss:$2 sm:$0xff] %v50_v2  ;;  %v1503_v10 = vld [vmem:[#allocation4 + $0x1f8] sm:$0xff]  ;;  %v1505_v11 = vld [vmem:[#allocation4 + $0x1f0] sm:$0xff]  ;;  %v1509_v12 = vld [vmem:[#allocation4 + $0x1c0] sm:$0xff] }
   0xb   :  { %v1511_v13 = vld [vmem:[#allocation4 + $0x1c8] sm:$0xff]  ;;  %v1515_v14 = vld [vmem:[#allocation4 + $0x1d8] sm:$0xff]  ;;  %v1517_v15 = vld [vmem:[#allocation4 + $0x1d0] sm:$0xff] }
   0xc   :  { %v1521_v16 = vld [vmem:[#allocation4 + $0x1a0] sm:$0xff]  ;;  %v1523_v17 = vld [vmem:[#allocation4 + $0x1a8] sm:$0xff]  ;;  %v1527_v18 = vld [vmem:[#allocation4 + $0x1b8] sm:$0xff] }
   0xd   :  { %v1529_v19 = vld [vmem:[#allocation4 + $0x1b0] sm:$0xff]  ;;  %v42_v20 = vld [vmem:[%s2457_s0 + $0x8] sm:$0xff]  ;;  %v1541_v22 = vld [vmem:[#allocation4 + $0x188] sm:$0xff] }
   0xe   :  { %v1539_v21 = vld [vmem:[#allocation4 + $0x180] sm:$0xff]  ;;  %v1546_v23 = vld [vmem:[#allocation4 + $0x198] sm:$0xff]  ;;  %v1548_v24 = vld [vmem:[#allocation4 + $0x190] sm:$0xff] }
   0xf   :  { %v1552_v25 = vld [vmem:[#allocation4 + $0x160] sm:$0xff]  ;;  %v1554_v26 = vld [vmem:[#allocation4 + $0x168] sm:$0xff]  ;;  %v1558_v27 = vld [vmem:[#allocation4 + $0x178] sm:$0xff] }
  0x10   :  { %v66_v4 = vld.sshfl [vmem:[#allocation1] sm:$0xff pattern:$0x75316420]  ;;  %v67_v5 = vld.sshfl [vmem:[#allocation1 + $0x8] sm:$0xff pattern:$0x75316420] }
  0x11   :  { %1231 = vmatpush.msk.msra.mxu0 %vm95_vm0, %v66_v4  ;;  %1240 = vmatpush.msk.msra.mxu1 %vm95_vm0, %v67_v5  ;;  %v68_v6 = vld.sshfl [vmem:[#allocation1 + $0x10] sm:$0xff pattern:$0x75316420]  ;;  %v69_v7 = vld.sshfl [vmem:[#allocation1 + $0x18] sm:$0xff pattern:$0x75316420] }
  0x12   :  { %1249 = vmatpush.msk.msra.mxu2 %vm95_vm0, %v68_v6  ;;  %1258 = vmatpush.msk.msra.mxu3 %vm95_vm0, %v69_v7  ;;  %v1560_v28 = vld [vmem:[#allocation4 + $0x170] sm:$0xff]  ;;  %v1564_v29 = vld [vmem:[#allocation4 + $0x140] sm:$0xff]  ;;  %v1566_v30 = vld [vmem:[#allocation4 + $0x148] sm:$0xff] }
  0x13   :  { %1232 = vmatmul.msk.f32.vlgmr.msra.gmra.mxu0 %vm70_vm1, %v41_v3  ;;  %1241 = vmatmul.msk.f32.vlgmr.msra.gmra.mxu1 %vm70_vm1, %v41_v3  ;;  %v1570_v31 = vld [vmem:[#allocation4 + $0x158] sm:$0xff]  ;;  %v1572_v32 = vld [vmem:[#allocation4 + $0x150] sm:$0xff]  ;;  %v43_v33 = vld [vmem:[%s2457_s0 + $0x10] sm:$0xff] }
  0x14   :  { %1250 = vmatmul.msk.f32.vlgmr.msra.gmra.mxu2 %vm70_vm1, %v41_v3  ;;  %1259 = vmatmul.msk.f32.vlgmr.msra.gmra.mxu3 %vm70_vm1, %v41_v3  ;;  %v1582_v34 = vld [vmem:[#allocation4 + $0x120] sm:$0xff]  ;;  %v1584_v35 = vld [vmem:[#allocation4 + $0x128] sm:$0xff]  ;;  %v1589_v36 = vld [vmem:[#allocation4 + $0x138] sm:$0xff] }
  0x15   :  { %368 = vmatpush.msrb.mxu0 %v1497_v8  ;;  %388 = vmatpush.msrb.mxu1 %v1499_v9  ;;  %v1591_v37 = vld [vmem:[#allocation4 + $0x130] sm:$0xff]  ;;  %v1595_v38 = vld [vmem:[#allocation4 + $0x100] sm:$0xff]  ;;  %v1597_v39 = vld [vmem:[#allocation4 + $0x108] sm:$0xff] }
  0x16   :  { %428 = vmatpush.msrb.mxu3 %v1503_v10  ;;  %408 = vmatpush.msrb.mxu2 %v1505_v11  ;;  %v1601_v40 = vld [vmem:[#allocation4 + $0x118] sm:$0xff]  ;;  %v1603_v41 = vld [vmem:[#allocation4 + $0x110] sm:$0xff]  ;;  %v1607_v42 = vld [vmem:[#allocation4 + $0xe0] sm:$0xff] }
  0x17   :  { %369 = vmatpush.msrb.mxu0 %v1509_v12  ;;  %389 = vmatpush.msrb.mxu1 %v1511_v13  ;;  %v1609_v43 = vld [vmem:[#allocation4 + $0xe8] sm:$0xff]  ;;  %v1613_v44 = vld [vmem:[#allocation4 + $0xf8] sm:$0xff]  ;;  %v1615_v45 = vld [vmem:[#allocation4 + $0xf0] sm:$0xff] }
  0x18   :  { %429 = vmatpush.msrb.mxu3 %v1515_v14  ;;  %409 = vmatpush.msrb.mxu2 %v1517_v15  ;;  %v44_v46 = vld [vmem:[%s2457_s0 + $0x18] sm:$0xff]  ;;  %v1625_v47 = vld [vmem:[#allocation4 + $0xc0] sm:$0xff]  ;;  %v1632_v49 = vld [vmem:[#allocation4 + $0xd8] sm:$0xff] }
  0x19   :  { %370 = vmatpush.msrb.mxu0 %v1521_v16  ;;  %390 = vmatpush.msrb.mxu1 %v1523_v17  ;;  %v1627_v48 = vld [vmem:[#allocation4 + $0xc8] sm:$0xff]  ;;  %v1634_v50 = vld [vmem:[#allocation4 + $0xd0] sm:$0xff]  ;;  %v1638_v51 = vld [vmem:[#allocation4 + $0xa0] sm:$0xff] }
  0x1a   :  { %430 = vmatpush.msrb.mxu3 %v1527_v18  ;;  %410 = vmatpush.msrb.mxu2 %v1529_v19  ;;  %2554 = vst [vmem:[#allocation7_spill] sm:$0xff] %v1638_v51  ;;  %v1640_v52 = vld [vmem:[#allocation4 + $0xa8] sm:$0xff]  ;;  %v1644_v53 = vld [vmem:[#allocation4 + $0xb8] sm:$0xff]  ;;  %v1646_v54 = vld [vmem:[#allocation4 + $0xb0] sm:$0xff] }
  0x1b   :  { %1233 = vmatmul.msk.f32.gmra.mxu0 %vm70_vm1, %v42_v20  ;;  %1242 = vmatmul.msk.f32.gmra.mxu1 %vm70_vm1, %v42_v20  ;;  %2555 = vst [vmem:[#allocation8_spill] sm:$0xff] %v1640_v52  ;;  %v1650_v55 = vld [vmem:[#allocation4 + $0x80] sm:$0xff]  ;;  %v1652_v56 = vld [vmem:[#allocation4 + $0x88] sm:$0xff]  ;;  %v1656_v57 = vld [vmem:[#allocation4 + $0x98] sm:$0xff] }
  0x1c   :  { %1251 = vmatmul.msk.f32.gmra.mxu2 %vm70_vm1, %v42_v20  ;;  %1260 = vmatmul.msk.f32.gmra.mxu3 %vm70_vm1, %v42_v20  ;;  %2556 = vst [vmem:[#allocation9_spill] sm:$0xff] %v1644_v53  ;;  %v1658_v58 = vld [vmem:[#allocation4 + $0x90] sm:$0xff]  ;;  %v1668_v60 = vld [vmem:[#allocation4 + $0x60] sm:$0xff]  ;;  %v1670_v61 = vld [vmem:[#allocation4 + $0x68] sm:$0xff] }
  0x1d   :  { %371 = vmatpush.msrb.mxu0 %v1539_v21  ;;  %391 = vmatpush.msrb.mxu1 %v1541_v22  ;;  %2557 = vst [vmem:[#allocation10_spill] sm:$0xff] %v1646_v54  ;;  %v45_v59 = vld [vmem:[%s2457_s0 + $0x20] sm:$0xff]  ;;  %v1681_v0 = vld [vmem:[#allocation4 + $0x40] sm:$0xff]  ;;  %v1683_v1 = vld [vmem:[#allocation4 + $0x48] sm:$0xff] }
  0x1e   :  { %431 = vmatpush.msrb.mxu3 %v1546_v23  ;;  %411 = vmatpush.msrb.mxu2 %v1548_v24  ;;  %2558 = vst [vmem:[#allocation11_spill] sm:$0xff] %v1650_v55  ;;  %v1675_v62 = vld [vmem:[#allocation4 + $0x78] sm:$0xff]  ;;  %v1677_v63 = vld [vmem:[#allocation4 + $0x70] sm:$0xff]  ;;  %v1693_v4 = vld [vmem:[#allocation4 + $0x20] sm:$0xff] }
  0x1f   :  { %372 = vmatpush.msrb.mxu0 %v1552_v25  ;;  %392 = vmatpush.msrb.mxu1 %v1554_v26  ;;  %2559 = vst [vmem:[#allocation12_spill] sm:$0xff] %v1652_v56  ;;  %v1687_v2 = vld [vmem:[#allocation4 + $0x58] sm:$0xff]  ;;  %v1689_v3 = vld [vmem:[#allocation4 + $0x50] sm:$0xff]  ;;  %v1695_v5 = vld [vmem:[#allocation4 + $0x28] sm:$0xff] }
  0x20   :  { %432 = vmatpush.msrb.mxu3 %v1558_v27  ;;  %412 = vmatpush.msrb.mxu2 %v1560_v28  ;;  %2560 = vst [vmem:[#allocation13_spill] sm:$0xff] %v1656_v57  ;;  %v1699_v6 = vld [vmem:[#allocation4 + $0x38] sm:$0xff]  ;;  %v1701_v7 = vld [vmem:[#allocation4 + $0x30] sm:$0xff] }
  0x21   :  { %373 = vmatpush.msrb.mxu0 %v1564_v29  ;;  %393 = vmatpush.msrb.mxu1 %v1566_v30  ;;  %2561 = vst [vmem:[#allocation14_spill] sm:$0xff] %v1658_v58  ;;  %v46_v20 = vld [vmem:[%s2457_s0 + $0x28] sm:$0xff] }
  0x22   :  { %433 = vmatpush.msrb.mxu3 %v1570_v31  ;;  %413 = vmatpush.msrb.mxu2 %v1572_v32  ;;  %2562 = vst [vmem:[#allocation15_spill] sm:$0xff] %v1668_v60 }
  0x23   :  { %1234 = vmatmul.msk.f32.gmra.mxu0 %vm70_vm1, %v43_v33  ;;  %1243 = vmatmul.msk.f32.gmra.mxu1 %vm70_vm1, %v43_v33  ;;  %2563 = vst [vmem:[#allocation16_spill] sm:$0xff] %v1670_v61 }
  0x24   :  { %1252 = vmatmul.msk.f32.gmra.mxu2 %vm70_vm1, %v43_v33  ;;  %1261 = vmatmul.msk.f32.gmra.mxu3 %vm70_vm1, %v43_v33  ;;  %2564 = vst [vmem:[#allocation17_spill] sm:$0xff] %v1675_v62  ;;  %v1711_v33 = vld [vmem:[#allocation4] sm:$0xff] }
  0x25   :  { %374 = vmatpush.msrb.mxu0 %v1582_v34  ;;  %394 = vmatpush.msrb.mxu1 %v1584_v35  ;;  %2565 = vst [vmem:[#allocation18_spill] sm:$0xff] %v1677_v63 }
  0x26   :  { %434 = vmatpush.msrb.mxu3 %v1589_v36  ;;  %414 = vmatpush.msrb.mxu2 %v1591_v37  ;;  %2566 = vst [vmem:[#allocation19_spill] sm:$0xff] %v1681_v0 }
  0x27   :  { %375 = vmatpush.msrb.mxu0 %v1595_v38  ;;  %395 = vmatpush.msrb.mxu1 %v1597_v39  ;;  %2567 = vst [vmem:[#allocation20_spill] sm:$0xff] %v1683_v1 }
  0x28   :  { %435 = vmatpush.msrb.mxu3 %v1601_v40  ;;  %415 = vmatpush.msrb.mxu2 %v1603_v41  ;;  %2568 = vst [vmem:[#allocation21_spill] sm:$0xff] %v1687_v2 }
  0x29   :  { %376 = vmatpush.msrb.mxu0 %v1607_v42  ;;  %396 = vmatpush.msrb.mxu1 %v1609_v43  ;;  %2569 = vst [vmem:[#allocation22_spill] sm:$0xff] %v1689_v3 }
  0x2a   :  { %436 = vmatpush.msrb.mxu3 %v1613_v44  ;;  %416 = vmatpush.msrb.mxu2 %v1615_v45  ;;  %2570 = vst [vmem:[#allocation23_spill] sm:$0xff] %v1693_v4 }
  0x2b   :  { %1235 = vmatmul.msk.f32.gmra.mxu0 %vm70_vm1, %v44_v46  ;;  %1244 = vmatmul.msk.f32.gmra.mxu1 %vm70_vm1, %v44_v46  ;;  %2571 = vst [vmem:[#allocation24_spill] sm:$0xff] %v1695_v5 }
  0x2c   :  { %1253 = vmatmul.msk.f32.gmra.mxu2 %vm70_vm1, %v44_v46  ;;  %1262 = vmatmul.msk.f32.gmra.mxu3 %vm70_vm1, %v44_v46  ;;  %2572 = vst [vmem:[#allocation25_spill] sm:$0xff] %v1699_v6  ;;  %v1713_v46 = vld [vmem:[#allocation4 + $0x8] sm:$0xff] }
  0x2d   :  { %377 = vmatpush.msrb.mxu0 %v1625_v47  ;;  %397 = vmatpush.msrb.mxu1 %v1627_v48  ;;  %2573 = vst [vmem:[#allocation26_spill] sm:$0xff] %v1701_v7 }
  0x2e   :  { %437 = vmatpush.msrb.mxu3 %v1632_v49  ;;  %417 = vmatpush.msrb.mxu2 %v1634_v50  ;;  %2574 = vst [vmem:[#allocation27_spill] sm:$0xff] %v1711_v33 }
  0x2f   :  { %378 = vmatpush.msrb.mxu0 %v1638_v51  ;;  %398 = vmatpush.msrb.mxu1 %v1640_v52  ;;  %2575 = vst [vmem:[#allocation28_spill] sm:$0xff] %v1713_v46 }
  0x30   :  { %438 = vmatpush.msrb.mxu3 %v1644_v53  ;;  %418 = vmatpush.msrb.mxu2 %v1646_v54 }
  0x31   :  { %379 = vmatpush.msrb.mxu0 %v1650_v55  ;;  %399 = vmatpush.msrb.mxu1 %v1652_v56 }
  0x32   :  { %439 = vmatpush.msrb.mxu3 %v1656_v57  ;;  %419 = vmatpush.msrb.mxu2 %v1658_v58 }
  0x33   :  { %1236 = vmatmul.msk.f32.gmra.mxu0 %vm70_vm1, %v45_v59  ;;  %1245 = vmatmul.msk.f32.gmra.mxu1 %vm70_vm1, %v45_v59 }
  0x34   :  { %1254 = vmatmul.msk.f32.gmra.mxu2 %vm70_vm1, %v45_v59  ;;  %1263 = vmatmul.msk.f32.gmra.mxu3 %vm70_vm1, %v45_v59  ;;  %v1718_v59 = vld [vmem:[#allocation4 + $0x18] sm:$0xff] }
  0x35   :  { %380 = vmatpush.msrb.mxu0 %v1668_v60  ;;  %400 = vmatpush.msrb.mxu1 %v1670_v61  ;;  %2576 = vst [vmem:[#allocation29_spill] sm:$0xff] %v1718_v59 }
  0x36   :  { %440 = vmatpush.msrb.mxu3 %v1675_v62  ;;  %420 = vmatpush.msrb.mxu2 %v1677_v63 }
  0x37   :  { %381 = vmatpush.msrb.mxu0 %v1681_v0  ;;  %401 = vmatpush.msrb.mxu1 %v1683_v1 }
  0x38   :  { %441 = vmatpush.msrb.mxu3 %v1687_v2  ;;  %421 = vmatpush.msrb.mxu2 %v1689_v3  ;;  %v1720_v2 = vld [vmem:[#allocation4 + $0x10] sm:$0xff] }
  0x39   :  { %382 = vmatpush.msrb.mxu0 %v1693_v4  ;;  %402 = vmatpush.msrb.mxu1 %v1695_v5  ;;  %2577 = vst [vmem:[#allocation30_spill] sm:$0xff] %v1720_v2 }
  0x3a   :  { %442 = vmatpush.msrb.mxu3 %v1699_v6  ;;  %422 = vmatpush.msrb.mxu2 %v1701_v7  ;;  %v47_v6 = vld [vmem:[%s2457_s0 + $0x30] sm:$0xff] }
  0x3b   :  { %1237 = vmatmul.msk.f32.gmra.mxu0 %vm70_vm1, %v46_v20  ;;  %1246 = vmatmul.msk.f32.gmra.mxu1 %vm70_vm1, %v46_v20 }
  0x3c   :  { %1255 = vmatmul.msk.f32.gmra.mxu2 %vm70_vm1, %v46_v20  ;;  %1264 = vmatmul.msk.f32.gmra.mxu3 %vm70_vm1, %v46_v20  ;;  %v48_v20 = vld [vmem:[%s2457_s0 + $0x38] sm:$0xff] }
  0x3d   :  { %383 = vmatpush.msrb.mxu0 %v1711_v33  ;;  %403 = vmatpush.msrb.mxu1 %v1713_v46 }
  0x3e   :  { %443 = vmatpush.msrb.mxu3 %v1718_v59  ;;  %423 = vmatpush.msrb.mxu2 %v1720_v2 }
  0x3f   :  { %474 = vmatpush.msra.mxu0 %v1497_v8  ;;  %494 = vmatpush.msra.mxu1 %v1499_v9 }
  0x40   :  { %514 = vmatpush.msra.mxu2 %v1505_v11  ;;  %534 = vmatpush.msra.mxu3 %v1503_v10 }
  0x41   :  { %475 = vmatpush.msra.mxu0 %v1509_v12  ;;  %495 = vmatpush.msra.mxu1 %v1511_v13 }
  0x42   :  { %515 = vmatpush.msra.mxu2 %v1517_v15  ;;  %535 = vmatpush.msra.mxu3 %v1515_v14 }
  0x43   :  { %1238 = vmatmul.msk.f32.gmra.mxu0 %vm70_vm1, %v47_v6  ;;  %1247 = vmatmul.msk.f32.gmra.mxu1 %vm70_vm1, %v47_v6 }
  0x44   :  { %1256 = vmatmul.msk.f32.gmra.mxu2 %vm70_vm1, %v47_v6  ;;  %1265 = vmatmul.msk.f32.gmra.mxu3 %vm70_vm1, %v47_v6  ;;  %v1446_v6 = vmov 0.0  }
  0x45   :  { %476 = vmatpush.msra.mxu0 %v1521_v16  ;;  %496 = vmatpush.msra.mxu1 %v1523_v17 }
  0x46   :  { %516 = vmatpush.msra.mxu2 %v1529_v19  ;;  %536 = vmatpush.msra.mxu3 %v1527_v18 }
  0x47   :  { %477 = vmatpush.msra.mxu0 %v1539_v21  ;;  %497 = vmatpush.msra.mxu1 %v1541_v22 }
  0x48   :  { %517 = vmatpush.msra.mxu2 %v1548_v24  ;;  %537 = vmatpush.msra.mxu3 %v1546_v23 }
  0x49   :  { %478 = vmatpush.msra.mxu0 %v1552_v25  ;;  %498 = vmatpush.msra.mxu1 %v1554_v26 }
  0x4a   :  { %518 = vmatpush.msra.mxu2 %v1560_v28  ;;  %538 = vmatpush.msra.mxu3 %v1558_v27 }
  0x4b   :  { %1239 = vmatmul.msk.f32.gmra.mxu0 %vm70_vm1, %v48_v20  ;;  %1248 = vmatmul.msk.f32.gmra.mxu1 %vm70_vm1, %v48_v20 }
  0x4c   :  { %1257 = vmatmul.msk.f32.gmra.mxu2 %vm70_vm1, %v48_v20  ;;  %1266 = vmatmul.msk.f32.gmra.mxu3 %vm70_vm1, %v48_v20  ;;  %v2578_v20 = vld [vmem:[#allocation21_spill] sm:$0xff] }
  0x4d   :  { %479 = vmatpush.msra.mxu0 %v1564_v29  ;;  %499 = vmatpush.msra.mxu1 %v1566_v30 }
  0x4e   :  { %519 = vmatpush.msra.mxu2 %v1572_v32  ;;  %539 = vmatpush.msra.mxu3 %v1570_v31 }
  0x4f   :  { %480 = vmatpush.msra.mxu0 %v1582_v34  ;;  %500 = vmatpush.msra.mxu1 %v1584_v35 }
  0x50   :  { %520 = vmatpush.msra.mxu2 %v1591_v37  ;;  %540 = vmatpush.msra.mxu3 %v1589_v36 }
  0x51   :  { %481 = vmatpush.msra.mxu0 %v1595_v38  ;;  %501 = vmatpush.msra.mxu1 %v1597_v39 }
  0x52   :  { %521 = vmatpush.msra.mxu2 %v1603_v41  ;;  %541 = vmatpush.msra.mxu3 %v1601_v40 }
  0x53   :  { %384 = vmatmul.f32.vlgmr.msrb.gmra.mxu0 %v1446_v6  ;;  %404 = vmatmul.f32.vlgmr.msrb.gmra.mxu1 %v1446_v6 }
  0x54   :  { %424 = vmatmul.f32.vlgmr.msrb.gmra.mxu2 %v1446_v6  ;;  %444 = vmatmul.f32.vlgmr.msrb.gmra.mxu3 %v1446_v6  ;;  %v2579_v6 = vld [vmem:[#allocation25_spill] sm:$0xff] }
  0x55   :  { %482 = vmatpush.msra.mxu0 %v1607_v42  ;;  %502 = vmatpush.msra.mxu1 %v1609_v43 }
  0x56   :  { %522 = vmatpush.msra.mxu2 %v1615_v45  ;;  %542 = vmatpush.msra.mxu3 %v1613_v44 }
  0x57   :  { %483 = vmatpush.msra.mxu0 %v1625_v47  ;;  %503 = vmatpush.msra.mxu1 %v1627_v48 }
  0x58   :  { %523 = vmatpush.msra.mxu2 %v1634_v50  ;;  %543 = vmatpush.msra.mxu3 %v1632_v49 }
  0x59   :  { %484 = vmatpush.msra.mxu0 %v1638_v51  ;;  %504 = vmatpush.msra.mxu1 %v1640_v52 }
  0x5a   :  { %524 = vmatpush.msra.mxu2 %v1646_v54  ;;  %544 = vmatpush.msra.mxu3 %v1644_v53 }
  0x5b   :  { %485 = vmatpush.msra.mxu0 %v1650_v55  ;;  %505 = vmatpush.msra.mxu1 %v1652_v56 }
  0x5c   :  { %525 = vmatpush.msra.mxu2 %v1658_v58  ;;  %545 = vmatpush.msra.mxu3 %v1656_v57 }
  0x5d   :  { %486 = vmatpush.msra.mxu0 %v1668_v60  ;;  %506 = vmatpush.msra.mxu1 %v1670_v61 }
  0x5e   :  { %526 = vmatpush.msra.mxu2 %v1677_v63  ;;  %546 = vmatpush.msra.mxu3 %v1675_v62 }
  0x5f   :  { %487 = vmatpush.msra.mxu0 %v1681_v0  ;;  %507 = vmatpush.msra.mxu1 %v1683_v1 }
  0x60   :  { %527 = vmatpush.msra.mxu2 %v1689_v3  ;;  %547 = vmatpush.msra.mxu3 %v2578_v20 }
  0x61   :  { %488 = vmatpush.msra.mxu0 %v1693_v4  ;;  %508 = vmatpush.msra.mxu1 %v1695_v5 }
  0x62   :  { %528 = vmatpush.msra.mxu2 %v1701_v7  ;;  %548 = vmatpush.msra.mxu3 %v2579_v6 }
  0x63   :  { %489 = vmatpush.msra.mxu0 %v1711_v33  ;;  %509 = vmatpush.msra.mxu1 %v1713_v46 }
  0x64   :  { %529 = vmatpush.msra.mxu2 %v1720_v2  ;;  %549 = vmatpush.msra.mxu3 %v1718_v59 }
  0x65   :  { %580 = vmatpush.msrb.mxu0 %v1497_v8  ;;  %600 = vmatpush.msrb.mxu1 %v1499_v9 }
  0x66   :  { %620 = vmatpush.msrb.mxu2 %v1505_v11  ;;  %640 = vmatpush.msrb.mxu3 %v1503_v10 }
  0x67   :  { %581 = vmatpush.msrb.mxu0 %v1509_v12  ;;  %601 = vmatpush.msrb.mxu1 %v1511_v13 }
  0x68   :  { %621 = vmatpush.msrb.mxu2 %v1517_v15  ;;  %641 = vmatpush.msrb.mxu3 %v1515_v14 }
  0x69   :  { %582 = vmatpush.msrb.mxu0 %v1521_v16  ;;  %602 = vmatpush.msrb.mxu1 %v1523_v17 }
  0x6a   :  { %622 = vmatpush.msrb.mxu2 %v1529_v19  ;;  %642 = vmatpush.msrb.mxu3 %v1527_v18 }
  0x6b   :  { %583 = vmatpush.msrb.mxu0 %v1539_v21  ;;  %603 = vmatpush.msrb.mxu1 %v1541_v22 }
  0x6c   :  { %623 = vmatpush.msrb.mxu2 %v1548_v24  ;;  %643 = vmatpush.msrb.mxu3 %v1546_v23 }
  0x6d   :  { %584 = vmatpush.msrb.mxu0 %v1552_v25  ;;  %604 = vmatpush.msrb.mxu1 %v1554_v26 }
  0x6e   :  { %624 = vmatpush.msrb.mxu2 %v1560_v28  ;;  %644 = vmatpush.msrb.mxu3 %v1558_v27 }
  0x6f   :  { %585 = vmatpush.msrb.mxu0 %v1564_v29  ;;  %605 = vmatpush.msrb.mxu1 %v1566_v30 }
  0x70   :  { %625 = vmatpush.msrb.mxu2 %v1572_v32  ;;  %645 = vmatpush.msrb.mxu3 %v1570_v31 }
  0x71   :  { %586 = vmatpush.msrb.mxu0 %v1582_v34  ;;  %606 = vmatpush.msrb.mxu1 %v1584_v35 }
  0x72   :  { %626 = vmatpush.msrb.mxu2 %v1591_v37  ;;  %646 = vmatpush.msrb.mxu3 %v1589_v36 }
  0x73   :  { %587 = vmatpush.msrb.mxu0 %v1595_v38  ;;  %607 = vmatpush.msrb.mxu1 %v1597_v39 }
  0x74   :  { %627 = vmatpush.msrb.mxu2 %v1603_v41  ;;  %647 = vmatpush.msrb.mxu3 %v1601_v40 }
  0x75   :  { %588 = vmatpush.msrb.mxu0 %v1607_v42  ;;  %608 = vmatpush.msrb.mxu1 %v1609_v43 }
  0x76   :  { %628 = vmatpush.msrb.mxu2 %v1615_v45  ;;  %648 = vmatpush.msrb.mxu3 %v1613_v44 }
  0x77   :  { %589 = vmatpush.msrb.mxu0 %v1625_v47  ;;  %609 = vmatpush.msrb.mxu1 %v1627_v48 }
  0x78   :  { %629 = vmatpush.msrb.mxu2 %v1634_v50  ;;  %649 = vmatpush.msrb.mxu3 %v1632_v49 }
  0x79   :  { %590 = vmatpush.msrb.mxu0 %v1638_v51  ;;  %610 = vmatpush.msrb.mxu1 %v1640_v52 }
  0x7a   :  { %630 = vmatpush.msrb.mxu2 %v1646_v54  ;;  %650 = vmatpush.msrb.mxu3 %v1644_v53 }
  0x7b   :  { %591 = vmatpush.msrb.mxu0 %v1650_v55  ;;  %611 = vmatpush.msrb.mxu1 %v1652_v56 }
  0x7c   :  { %631 = vmatpush.msrb.mxu2 %v1658_v58  ;;  %651 = vmatpush.msrb.mxu3 %v1656_v57 }
  0x7d   :  { %592 = vmatpush.msrb.mxu0 %v1668_v60  ;;  %612 = vmatpush.msrb.mxu1 %v1670_v61 }
  0x7e   :  { %632 = vmatpush.msrb.mxu2 %v1677_v63  ;;  %652 = vmatpush.msrb.mxu3 %v1675_v62 }
  0x7f   :  { %593 = vmatpush.msrb.mxu0 %v1681_v0  ;;  %613 = vmatpush.msrb.mxu1 %v1683_v1 }
  0x80   :  { %633 = vmatpush.msrb.mxu2 %v1689_v3  ;;  %653 = vmatpush.msrb.mxu3 %v2578_v20 }
  0x81   :  { %594 = vmatpush.msrb.mxu0 %v1693_v4  ;;  %614 = vmatpush.msrb.mxu1 %v1695_v5  ;;  %v51_v4 = vld [vmem:[%s2460_s3] sm:$0xf] }
  0x82   :  { %634 = vmatpush.msrb.mxu2 %v1701_v7  ;;  %654 = vmatpush.msrb.mxu3 %v2579_v6  ;;  %v53_v20 = vperm.slane %v51_v4, 0  ;;  %v54_v5 = vperm.slane %v51_v4, 1 }
  0x83   :  { %595 = vmatpush.msrb.mxu0 %v1711_v33  ;;  %615 = vmatpush.msrb.mxu1 %v1713_v46 }
  0x84   :  { %635 = vmatpush.msrb.mxu2 %v1720_v2  ;;  %655 = vmatpush.msrb.mxu3 %v1718_v59  ;;  %v1881_v2 = vperm.slane %v51_v4, 2  ;;  %v1883_v59 = vperm.slane %v51_v4, 3 }
  0x90   :  { %v121_v1 = vpop.f32.mrf.mxu0  ;;  %v162_v3 = vpop.f32.mrf.mxu1 }
  0x97   :  { %v1873_v0 = vpop.f32.mrf.mxu2  ;;  %v1875_v7 = vpop.f32.mrf.mxu3 }
  0x98   :  { %v124_v6 = vpop.f32.mrf.mxu0  ;;  %v165_v33 = vpop.f32.mrf.mxu1 }
  0x99   :  { %v1877_v62 = vadd.f32 %v124_v6, %v53_v20  ;;  %v1879_v46 = vadd.f32 %v165_v33, %v54_v5 }
  0x9b   :  { %2580 = vst [vmem:[#allocation31_spill] sm:$0xff] %v1877_v62 }
  0x9c   :  { %2581 = vst [vmem:[#allocation32_spill] sm:$0xff] %v1879_v46 }
  0x9f   :  { %v206_v63 = vpop.f32.mrf.mxu2  ;;  %v247_v61 = vpop.f32.mrf.mxu3 }
  0xa0   :  { %v1886_v60 = vadd.f32 %v206_v63, %v1881_v2  ;;  %v1889_v57 = vadd.f32 %v247_v61, %v1883_v59  ;;  %v127_v58 = vpop.f32.mrf.mxu0  ;;  %v168_v56 = vpop.f32.mrf.mxu1 }
  0xa1   :  { %v1891_v55 = vadd.f32 %v127_v58, %v53_v20  ;;  %v1893_v6 = vadd.f32 %v168_v56, %v54_v5 }
  0xa2   :  { %2582 = vst [vmem:[#allocation33_spill] sm:$0xff] %v1886_v60 }
  0xa3   :  { %2583 = vst [vmem:[#allocation34_spill] sm:$0xff] %v1889_v57 }
  0xa4   :  { %2584 = vst [vmem:[#allocation35_spill] sm:$0xff] %v1891_v55 }
  0xa5   :  { %2585 = vst [vmem:[#allocation36_spill] sm:$0xff] %v1893_v6 }
  0xa7   :  { %v209_v33 = vpop.f32.mrf.mxu2  ;;  %v250_v46 = vpop.f32.mrf.mxu3 }
  0xa8   :  { %v1896_v62 = vadd.f32 %v209_v33, %v1881_v2  ;;  %v1899_v4 = vadd.f32 %v250_v46, %v1883_v59  ;;  %v130_v53 = vpop.f32.mrf.mxu0  ;;  %v171_v63 = vpop.f32.mrf.mxu1 }
  0xa9   :  { %v1901_v60 = vadd.f32 %v130_v53, %v53_v20  ;;  %v1903_v61 = vadd.f32 %v171_v63, %v54_v5 }
  0xaa   :  { %2586 = vst [vmem:[#allocation37_spill] sm:$0xff] %v1896_v62 }
  0xab   :  { %2587 = vst [vmem:[#allocation38_spill] sm:$0xff] %v1899_v4 }
  0xac   :  { %2588 = vst [vmem:[#allocation39_spill] sm:$0xff] %v1901_v60 }
  0xad   :  { %2589 = vst [vmem:[#allocation40_spill] sm:$0xff] %v1903_v61 }
  0xaf   :  { %v212_v57 = vpop.f32.mrf.mxu2  ;;  %v253_v54 = vpop.f32.mrf.mxu3 }
  0xb0   :  { %v1906_v58 = vadd.f32 %v212_v57, %v1881_v2  ;;  %v1909_v56 = vadd.f32 %v253_v54, %v1883_v59  ;;  %v133_v6 = vpop.f32.mrf.mxu0  ;;  %v174_v33 = vpop.f32.mrf.mxu1 }
  0xb1   :  { %v1911_v62 = vadd.f32 %v133_v6, %v53_v20  ;;  %v1913_v46 = vadd.f32 %v174_v33, %v54_v5 }
  0xb2   :  { %2590 = vst [vmem:[#allocation41_spill] sm:$0xff] %v1906_v58 }
  0xb3   :  { %2591 = vst [vmem:[#allocation42_spill] sm:$0xff] %v1909_v56 }
  0xb4   :  { %2592 = vst [vmem:[#allocation43_spill] sm:$0xff] %v1911_v62 }
  0xb5   :  { %2593 = vst [vmem:[#allocation44_spill] sm:$0xff] %v1913_v46 }
  0xb7   :  { %v215_v4 = vpop.f32.mrf.mxu2  ;;  %v256_v55 = vpop.f32.mrf.mxu3 }
  0xb8   :  { %v1916_v53 = vadd.f32 %v215_v4, %v1881_v2  ;;  %v1919_v63 = vadd.f32 %v256_v55, %v1883_v59  ;;  %v136_v61 = vpop.f32.mrf.mxu0  ;;  %v177_v57 = vpop.f32.mrf.mxu1 }
  0xb9   :  { %v1921_v58 = vadd.f32 %v136_v61, %v53_v20  ;;  %v1923_v54 = vadd.f32 %v177_v57, %v54_v5 }
  0xba   :  { %2594 = vst [vmem:[#allocation45_spill] sm:$0xff] %v1916_v53 }
  0xbb   :  { %2595 = vst [vmem:[#allocation46_spill] sm:$0xff] %v1919_v63 }
  0xbc   :  { %2596 = vst [vmem:[#allocation47_spill] sm:$0xff] %v1921_v58  ;;  %v163_v58 = vadd.f32 %v162_v3, %v54_v5 }
  0xbd   :  { %2597 = vst [vmem:[#allocation48_spill] sm:$0xff] %v1923_v54 }
  0xbf   :  { %v218_v56 = vpop.f32.mrf.mxu2  ;;  %v259_v60 = vpop.f32.mrf.mxu3 }
  0xc0   :  { %v1926_v6 = vadd.f32 %v218_v56, %v1881_v2  ;;  %v1929_v33 = vadd.f32 %v259_v60, %v1883_v59  ;;  %v139_v46 = vpop.f32.mrf.mxu0  ;;  %v180_v4 = vpop.f32.mrf.mxu1 }
  0xc1   :  { %v1931_v53 = vadd.f32 %v139_v46, %v53_v20  ;;  %v1933_v55 = vadd.f32 %v180_v4, %v54_v5 }
  0xc2   :  { %2598 = vst [vmem:[#allocation49_spill] sm:$0xff] %v1926_v6 }
  0xc3   :  { %2599 = vst [vmem:[#allocation50_spill] sm:$0xff] %v1929_v33  ;;  %v122_v33 = vadd.f32 %v121_v1, %v53_v20  ;;  %v245_v1 = vadd.f32 %v1875_v7, %v1883_v59 }
  0xc4   :  { %2600 = vst [vmem:[#allocation51_spill] sm:$0xff] %v1931_v53 }
  0xc5   :  { %2601 = vst [vmem:[#allocation52_spill] sm:$0xff] %v1933_v55 }
  0xc7   :  { %v221_v63 = vpop.f32.mrf.mxu2  ;;  %v262_v62 = vpop.f32.mrf.mxu3 }
  0xc8   :  { %v1936_v61 = vadd.f32 %v221_v63, %v1881_v2  ;;  %v1939_v57 = vadd.f32 %v262_v62, %v1883_v59  ;;  %v142_v54 = vpop.f32.mrf.mxu0  ;;  %v183_v56 = vpop.f32.mrf.mxu1 }
  0xc9   :  { %v1941_v6 = vadd.f32 %v142_v54, %v53_v20  ;;  %v1943_v60 = vadd.f32 %v183_v56, %v54_v5  ;;  %v204_v54 = vadd.f32 %v1873_v0, %v1881_v2 }
  0xca   :  { %2602 = vst [vmem:[#allocation53_spill] sm:$0xff] %v1936_v61 }
  0xcb   :  { %2603 = vst [vmem:[#allocation54_spill] sm:$0xff] %v1939_v57 }
  0xcc   :  { %2604 = vst [vmem:[#allocation55_spill] sm:$0xff] %v1941_v6  ;;  %v2630_v6 = vld [vmem:[#allocation30_spill] sm:$0xff] }
  0xcd   :  { %2605 = vst [vmem:[#allocation56_spill] sm:$0xff] %v1943_v60  ;;  %v2629_v60 = vld [vmem:[#allocation28_spill] sm:$0xff] }
  0xcf   :  { %v224_v46 = vpop.f32.mrf.mxu2  ;;  %v265_v53 = vpop.f32.mrf.mxu3 }
  0xd0   :  { %v1946_v4 = vadd.f32 %v224_v46, %v1881_v2  ;;  %v1949_v55 = vadd.f32 %v265_v53, %v1883_v59  ;;  %v385_v63 = vpop.f32.mrf.mxu0  ;;  %v405_v61 = vpop.f32.mrf.mxu1 }
  0xd1   :  { %v448_v62 = vadd.f32 %v385_v63, %v122_v33  ;;  %v449_v57 = vadd.f32 %v405_v61, %v163_v58 }
  0xd2   :  { %2606 = vst [vmem:[#allocation57_spill] sm:$0xff] %v1946_v4  ;;  %v2628_v4 = vld [vmem:[#allocation27_spill] sm:$0xff] }
  0xd3   :  { %2607 = vst [vmem:[#allocation58_spill] sm:$0xff] %v1949_v55  ;;  %v452_v52 = vmul.f32 0.5, %v448_v62  ;;  %v453_v51 = vmul.f32 0.5, %v449_v57 }
  0xd5   :  { %1273 = vtanh.f32 %v452_v52 }
  0xd6   :  { %1275 = vtanh.f32 %v453_v51 }
  0xd7   :  { %v425_v3 = vpop.f32.mrf.mxu2  ;;  %v445_v5 = vpop.f32.mrf.mxu3 }
  0xd8   :  { %v450_v20 = vadd.f32 %v425_v3, %v204_v54  ;;  %v451_v56 = vadd.f32 %v445_v5, %v245_v1  ;;  %v2609_v1 = vld [vmem:[#allocation8_spill] sm:$0xff]  ;;  %v2610_v3 = vld [vmem:[#allocation10_spill] sm:$0xff]  ;;  %v2611_v5 = vld [vmem:[#allocation9_spill] sm:$0xff] }
  0xda   :  { %v454_v53 = vmul.f32 0.5, %v450_v20  ;;  %1277 = vtanh.f32 %v451_v56  ;;  %v2612_v20 = vld [vmem:[#allocation11_spill] sm:$0xff]  ;;  %v2613_v56 = vld [vmem:[#allocation12_spill] sm:$0xff] }
  0xdb   :  { %v1274_v46 = vpop.eup %1273 }
  0xdc   :  { %v1276_v55 = vpop.eup %1275  ;;  %v458_v33 = vadd.f32 1.0, %v1274_v46  ;;  %1279 = vtanh.f32 %v454_v53  ;;  %v2614_v53 = vld [vmem:[#allocation14_spill] sm:$0xff]  ;;  %v2615_v46 = vld [vmem:[#allocation13_spill] sm:$0xff] }
  0xdd   :  { %v459_v58 = vadd.f32 1.0, %v1276_v55  ;;  %v2608_v55 = vld [vmem:[#allocation7_spill] sm:$0xff] }
  0xde   :  { %v461_v61 = vmul.f32 0.5, %v458_v33  ;;  %v2616_v33 = vld [vmem:[#allocation15_spill] sm:$0xff] }
  0xdf   :  { %v462_v52 = vmul.f32 0.5, %v459_v58  ;;  %v2617_v58 = vld [vmem:[#allocation16_spill] sm:$0xff] }
  0xe0   :  { %v1278_v57 = vpop.eup %1277 }
  0xe1   :  { %v465_v63 = vmul.f32 0.0, %v462_v52  ;;  %v466_v0 = vmul.f32 %v1278_v57, %v461_v61  ;;  %v2618_v61 = vld [vmem:[#allocation18_spill] sm:$0xff]  ;;  %v2619_v52 = vld [vmem:[#allocation17_spill] sm:$0xff]  ;;  %v2620_v57 = vld [vmem:[#allocation19_spill] sm:$0xff] }
  0xe2   :  { %v1280_v2 = vpop.eup %1279 }
  0xe3   :  { %v1955_v62 = vadd.f32 %v466_v0, %v465_v63  ;;  %v460_v51 = vadd.f32 1.0, %v1280_v2  ;;  %v2621_v63 = vld [vmem:[#allocation20_spill] sm:$0xff]  ;;  %v2622_v0 = vld [vmem:[#allocation22_spill] sm:$0xff]  ;;  %v2623_v2 = vld [vmem:[#allocation21_spill] sm:$0xff] }
  0xe5   :  { %1281 = vtanh.f32 %v1955_v62  ;;  %v463_v7 = vmul.f32 0.5, %v460_v51  ;;  %v2624_v51 = vld [vmem:[#allocation23_spill] sm:$0xff] }
  0xeb   :  { %v1282_v59 = vpop.eup %1281 }
  0xec   :  { %v469_v54 = vmul.f32 %v1282_v59, %v463_v7  ;;  %v2625_v7 = vld [vmem:[#allocation24_spill] sm:$0xff]  ;;  %v2626_v59 = vld [vmem:[#allocation26_spill] sm:$0xff] }
  0xee   :  { %490 = vmatmul.f32.vlgmr.msra.gmra.mxu0 %v469_v54  ;;  %510 = vmatmul.f32.vlgmr.msra.gmra.mxu1 %v469_v54 }
  0xef   :  { %530 = vmatmul.f32.vlgmr.msra.gmra.mxu2 %v469_v54  ;;  %550 = vmatmul.f32.vlgmr.msra.gmra.mxu3 %v469_v54  ;;  %v2627_v54 = vld [vmem:[#allocation25_spill] sm:$0xff] }
  0xf0   :  { %686 = vmatpush.msra.mxu0 %v1497_v8  ;;  %706 = vmatpush.msra.mxu1 %v1499_v9 }
  0xf1   :  { %726 = vmatpush.msra.mxu2 %v1505_v11  ;;  %746 = vmatpush.msra.mxu3 %v1503_v10 }
  0xf2   :  { %687 = vmatpush.msra.mxu0 %v1509_v12  ;;  %707 = vmatpush.msra.mxu1 %v1511_v13 }
  0xf3   :  { %727 = vmatpush.msra.mxu2 %v1517_v15  ;;  %747 = vmatpush.msra.mxu3 %v1515_v14 }
  0xf4   :  { %688 = vmatpush.msra.mxu0 %v1521_v16  ;;  %708 = vmatpush.msra.mxu1 %v1523_v17 }
  0xf5   :  { %728 = vmatpush.msra.mxu2 %v1529_v19  ;;  %748 = vmatpush.msra.mxu3 %v1527_v18 }
  0xf6   :  { %689 = vmatpush.msra.mxu0 %v1539_v21  ;;  %709 = vmatpush.msra.mxu1 %v1541_v22 }
  0xf7   :  { %729 = vmatpush.msra.mxu2 %v1548_v24  ;;  %749 = vmatpush.msra.mxu3 %v1546_v23 }
  0xf8   :  { %690 = vmatpush.msra.mxu0 %v1552_v25  ;;  %710 = vmatpush.msra.mxu1 %v1554_v26 }
  0xf9   :  { %730 = vmatpush.msra.mxu2 %v1560_v28  ;;  %750 = vmatpush.msra.mxu3 %v1558_v27 }
  0xfa   :  { %691 = vmatpush.msra.mxu0 %v1564_v29  ;;  %711 = vmatpush.msra.mxu1 %v1566_v30 }
  0xfb   :  { %731 = vmatpush.msra.mxu2 %v1572_v32  ;;  %751 = vmatpush.msra.mxu3 %v1570_v31 }
  0xfc   :  { %692 = vmatpush.msra.mxu0 %v1582_v34  ;;  %712 = vmatpush.msra.mxu1 %v1584_v35 }
  0xfd   :  { %732 = vmatpush.msra.mxu2 %v1591_v37  ;;  %752 = vmatpush.msra.mxu3 %v1589_v36 }
  0xfe   :  { %693 = vmatpush.msra.mxu0 %v1595_v38  ;;  %713 = vmatpush.msra.mxu1 %v1597_v39 }
  0xff   :  { %733 = vmatpush.msra.mxu2 %v1603_v41  ;;  %753 = vmatpush.msra.mxu3 %v1601_v40 }
 0x100   :  { %694 = vmatpush.msra.mxu0 %v1607_v42  ;;  %714 = vmatpush.msra.mxu1 %v1609_v43 }
 0x101   :  { %734 = vmatpush.msra.mxu2 %v1615_v45  ;;  %754 = vmatpush.msra.mxu3 %v1613_v44 }
 0x102   :  { %695 = vmatpush.msra.mxu0 %v1625_v47  ;;  %715 = vmatpush.msra.mxu1 %v1627_v48 }
 0x103   :  { %735 = vmatpush.msra.mxu2 %v1634_v50  ;;  %755 = vmatpush.msra.mxu3 %v1632_v49 }
 0x104   :  { %696 = vmatpush.msra.mxu0 %v2608_v55  ;;  %716 = vmatpush.msra.mxu1 %v2609_v1 }
 0x105   :  { %736 = vmatpush.msra.mxu2 %v2610_v3  ;;  %756 = vmatpush.msra.mxu3 %v2611_v5 }
 0x106   :  { %697 = vmatpush.msra.mxu0 %v2612_v20  ;;  %717 = vmatpush.msra.mxu1 %v2613_v56 }
 0x107   :  { %737 = vmatpush.msra.mxu2 %v2614_v53  ;;  %757 = vmatpush.msra.mxu3 %v2615_v46  ;;  %v2635_v46 = vld [vmem:[#allocation34_spill] sm:$0xff] }
 0x108   :  { %698 = vmatpush.msra.mxu0 %v2616_v33  ;;  %718 = vmatpush.msra.mxu1 %v2617_v58  ;;  %v2634_v33 = vld [vmem:[#allocation33_spill] sm:$0xff] }
 0x109   :  { %738 = vmatpush.msra.mxu2 %v2618_v61  ;;  %758 = vmatpush.msra.mxu3 %v2619_v52  ;;  %v2632_v52 = vld [vmem:[#allocation31_spill] sm:$0xff]  ;;  %v2633_v61 = vld [vmem:[#allocation32_spill] sm:$0xff] }
 0x10a   :  { %699 = vmatpush.msra.mxu0 %v2620_v57  ;;  %719 = vmatpush.msra.mxu1 %v2621_v63  ;;  %v2631_v57 = vld [vmem:[#allocation29_spill] sm:$0xff] }
 0x10b   :  { %739 = vmatpush.msra.mxu2 %v2622_v0  ;;  %759 = vmatpush.msra.mxu3 %v2623_v2 }
 0x10c   :  { %700 = vmatpush.msra.mxu0 %v2624_v51  ;;  %720 = vmatpush.msra.mxu1 %v2625_v7 }
 0x10d   :  { %740 = vmatpush.msra.mxu2 %v2626_v59  ;;  %760 = vmatpush.msra.mxu3 %v2627_v54 }
 0x10e   :  { %701 = vmatpush.msra.mxu0 %v2628_v4  ;;  %721 = vmatpush.msra.mxu1 %v2629_v60 }
 0x10f   :  { %741 = vmatpush.msra.mxu2 %v2630_v6  ;;  %761 = vmatpush.msra.mxu3 %v2631_v57 }
 0x16b   :  { %v491_v63 = vpop.f32.mrf.mxu0  ;;  %v511_v0 = vpop.f32.mrf.mxu1 }
 0x16c   :  { %v554_v2 = vadd.f32 %v491_v63, %v2632_v52  ;;  %v555_v51 = vadd.f32 %v511_v0, %v2633_v61 }
 0x16e   :  { %v558_v58 = vmul.f32 0.5, %v554_v2  ;;  %v559_v7 = vmul.f32 0.5, %v555_v51 }
 0x170   :  { %1283 = vtanh.f32 %v558_v58 }
 0x171   :  { %1285 = vtanh.f32 %v559_v7  ;;  %v2102_v7 = vld [vmem:[#allocation4 + $0x1e0] sm:$0xff] }
 0x172   :  { %v531_v59 = vpop.f32.mrf.mxu2  ;;  %v551_v54 = vpop.f32.mrf.mxu3 }
 0x173   :  { %v556_v4 = vadd.f32 %v531_v59, %v2634_v33  ;;  %v557_v60 = vadd.f32 %v551_v54, %v2635_v46  ;;  %v2105_v59 = vld [vmem:[#allocation4 + $0x1e8] sm:$0xff]  ;;  %v2108_v54 = vld [vmem:[#allocation4 + $0x1f0] sm:$0xff] }
 0x175   :  { %v560_v53 = vmul.f32 0.5, %v556_v4  ;;  %1287 = vtanh.f32 %v557_v60 }
 0x176   :  { %v1284_v6 = vpop.eup %1283 }
 0x177   :  { %v1286_v57 = vpop.eup %1285  ;;  %v564_v56 = vadd.f32 1.0, %v1284_v6  ;;  %1289 = vtanh.f32 %v560_v53 }
 0x178   :  { %v565_v20 = vadd.f32 1.0, %v1286_v57 }
 0x179   :  { %v567_v52 = vmul.f32 0.5, %v564_v56 }
 0x17a   :  { %v568_v63 = vmul.f32 0.5, %v565_v20 }
 0x17b   :  { %v1288_v61 = vpop.eup %1287 }
 0x17c   :  { %v571_v0 = vmul.f32 %v568_v63, %v1955_v62  ;;  %v572_v58 = vmul.f32 %v1288_v61, %v567_v52  ;;  %v2111_v52 = vld [vmem:[#allocation4 + $0x1f8] sm:$0xff]  ;;  %v2114_v63 = vld [vmem:[#allocation4 + $0x1c0] sm:$0xff]  ;;  %v2117_v61 = vld [vmem:[#allocation4 + $0x1c8] sm:$0xff] }
 0x17d   :  { %v1290_v2 = vpop.eup %1289 }
 0x17e   :  { %v2027_v51 = vadd.f32 %v572_v58, %v571_v0  ;;  %v566_v33 = vadd.f32 1.0, %v1290_v2  ;;  %v2120_v0 = vld [vmem:[#allocation4 + $0x1d0] sm:$0xff]  ;;  %v2123_v58 = vld [vmem:[#allocation4 + $0x1d8] sm:$0xff]  ;;  %v2126_v2 = vld [vmem:[#allocation4 + $0x1a0] sm:$0xff] }
 0x180   :  { %1291 = vtanh.f32 %v2027_v51  ;;  %v569_v46 = vmul.f32 0.5, %v566_v33  ;;  %v2132_v33 = vld [vmem:[#allocation4 + $0x1b0] sm:$0xff] }
 0x186   :  { %v1292_v4 = vpop.eup %1291 }
 0x187   :  { %v575_v60 = vmul.f32 %v1292_v4, %v569_v46  ;;  %v2135_v46 = vld [vmem:[#allocation4 + $0x1b8] sm:$0xff]  ;;  %v2138_v4 = vld [vmem:[#allocation4 + $0x180] sm:$0xff] }
 0x189   :  { %596 = vmatmul.f32.vlgmr.msrb.gmra.mxu0 %v575_v60  ;;  %616 = vmatmul.f32.vlgmr.msrb.gmra.mxu1 %v575_v60 }
 0x18a   :  { %636 = vmatmul.f32.vlgmr.msrb.gmra.mxu2 %v575_v60  ;;  %656 = vmatmul.f32.vlgmr.msrb.gmra.mxu3 %v575_v60  ;;  %v2141_v60 = vld [vmem:[#allocation4 + $0x188] sm:$0xff] }
 0x18b   :  { %792 = vmatpush.msrb.mxu0 %v1497_v8  ;;  %812 = vmatpush.msrb.mxu1 %v1499_v9  ;;  %v2636_v8 = vld [vmem:[#allocation11_spill] sm:$0xff]  ;;  %v2637_v9 = vld [vmem:[#allocation12_spill] sm:$0xff] }
 0x18c   :  { %832 = vmatpush.msrb.mxu2 %v1505_v11  ;;  %852 = vmatpush.msrb.mxu3 %v1503_v10  ;;  %v2638_v10 = vld [vmem:[#allocation14_spill] sm:$0xff]  ;;  %v2639_v11 = vld [vmem:[#allocation13_spill] sm:$0xff] }
 0x18d   :  { %793 = vmatpush.msrb.mxu0 %v1509_v12  ;;  %813 = vmatpush.msrb.mxu1 %v1511_v13  ;;  %v2640_v12 = vld [vmem:[#allocation15_spill] sm:$0xff]  ;;  %v2641_v13 = vld [vmem:[#allocation16_spill] sm:$0xff] }
 0x18e   :  { %833 = vmatpush.msrb.mxu2 %v1517_v15  ;;  %853 = vmatpush.msrb.mxu3 %v1515_v14  ;;  %v2642_v14 = vld [vmem:[#allocation18_spill] sm:$0xff]  ;;  %v2643_v15 = vld [vmem:[#allocation17_spill] sm:$0xff] }
 0x18f   :  { %794 = vmatpush.msrb.mxu0 %v1521_v16  ;;  %814 = vmatpush.msrb.mxu1 %v1523_v17  ;;  %v2644_v16 = vld [vmem:[#allocation19_spill] sm:$0xff]  ;;  %v2645_v17 = vld [vmem:[#allocation20_spill] sm:$0xff] }
 0x190   :  { %834 = vmatpush.msrb.mxu2 %v1529_v19  ;;  %854 = vmatpush.msrb.mxu3 %v1527_v18  ;;  %v2646_v18 = vld [vmem:[#allocation22_spill] sm:$0xff]  ;;  %v2647_v19 = vld [vmem:[#allocation21_spill] sm:$0xff] }
 0x191   :  { %795 = vmatpush.msrb.mxu0 %v1539_v21  ;;  %815 = vmatpush.msrb.mxu1 %v1541_v22  ;;  %v2648_v21 = vld [vmem:[#allocation23_spill] sm:$0xff]  ;;  %v2649_v22 = vld [vmem:[#allocation24_spill] sm:$0xff] }
 0x192   :  { %835 = vmatpush.msrb.mxu2 %v1548_v24  ;;  %855 = vmatpush.msrb.mxu3 %v1546_v23  ;;  %v2650_v23 = vld [vmem:[#allocation26_spill] sm:$0xff]  ;;  %v2651_v24 = vld [vmem:[#allocation25_spill] sm:$0xff] }
 0x193   :  { %796 = vmatpush.msrb.mxu0 %v1552_v25  ;;  %816 = vmatpush.msrb.mxu1 %v1554_v26  ;;  %v2652_v25 = vld [vmem:[#allocation27_spill] sm:$0xff]  ;;  %v2653_v26 = vld [vmem:[#allocation28_spill] sm:$0xff] }
 0x194   :  { %836 = vmatpush.msrb.mxu2 %v1560_v28  ;;  %856 = vmatpush.msrb.mxu3 %v1558_v27  ;;  %v2654_v27 = vld [vmem:[#allocation30_spill] sm:$0xff]  ;;  %v2655_v28 = vld [vmem:[#allocation29_spill] sm:$0xff] }
 0x195   :  { %797 = vmatpush.msrb.mxu0 %v1564_v29  ;;  %817 = vmatpush.msrb.mxu1 %v1566_v30 }
 0x196   :  { %837 = vmatpush.msrb.mxu2 %v1572_v32  ;;  %857 = vmatpush.msrb.mxu3 %v1570_v31  ;;  %v2656_v31 = vld [vmem:[#allocation35_spill] sm:$0xff] }
 0x197   :  { %798 = vmatpush.msrb.mxu0 %v1582_v34  ;;  %818 = vmatpush.msrb.mxu1 %v1584_v35  ;;  %v2657_v34 = vld [vmem:[#allocation36_spill] sm:$0xff] }
 0x198   :  { %838 = vmatpush.msrb.mxu2 %v1591_v37  ;;  %858 = vmatpush.msrb.mxu3 %v1589_v36 }
 0x199   :  { %799 = vmatpush.msrb.mxu0 %v1595_v38  ;;  %819 = vmatpush.msrb.mxu1 %v1597_v39 }
 0x19a   :  { %839 = vmatpush.msrb.mxu2 %v1603_v41  ;;  %859 = vmatpush.msrb.mxu3 %v1601_v40  ;;  %v2658_v40 = vld [vmem:[#allocation37_spill] sm:$0xff] }
 0x19b   :  { %800 = vmatpush.msrb.mxu0 %v1607_v42  ;;  %820 = vmatpush.msrb.mxu1 %v1609_v43  ;;  %v2659_v42 = vld [vmem:[#allocation38_spill] sm:$0xff] }
 0x19c   :  { %840 = vmatpush.msrb.mxu2 %v1615_v45  ;;  %860 = vmatpush.msrb.mxu3 %v1613_v44 }
 0x19d   :  { %801 = vmatpush.msrb.mxu0 %v1625_v47  ;;  %821 = vmatpush.msrb.mxu1 %v1627_v48 }
 0x19e   :  { %841 = vmatpush.msrb.mxu2 %v1634_v50  ;;  %861 = vmatpush.msrb.mxu3 %v1632_v49 }
 0x19f   :  { %802 = vmatpush.msrb.mxu0 %v2608_v55  ;;  %822 = vmatpush.msrb.mxu1 %v2609_v1 }
 0x1a0   :  { %842 = vmatpush.msrb.mxu2 %v2610_v3  ;;  %862 = vmatpush.msrb.mxu3 %v2611_v5 }
 0x1a1   :  { %803 = vmatpush.msrb.mxu0 %v2636_v8  ;;  %823 = vmatpush.msrb.mxu1 %v2637_v9  ;;  %v2144_v8 = vld [vmem:[#allocation4 + $0x190] sm:$0xff]  ;;  %v2147_v9 = vld [vmem:[#allocation4 + $0x198] sm:$0xff] }
 0x1a2   :  { %843 = vmatpush.msrb.mxu2 %v2638_v10  ;;  %863 = vmatpush.msrb.mxu3 %v2639_v11  ;;  %v2150_v10 = vld [vmem:[#allocation4 + $0x160] sm:$0xff]  ;;  %v2153_v11 = vld [vmem:[#allocation4 + $0x168] sm:$0xff] }
 0x1a3   :  { %804 = vmatpush.msrb.mxu0 %v2640_v12  ;;  %824 = vmatpush.msrb.mxu1 %v2641_v13  ;;  %v2156_v12 = vld [vmem:[#allocation4 + $0x170] sm:$0xff]  ;;  %v2159_v13 = vld [vmem:[#allocation4 + $0x178] sm:$0xff] }
 0x1a4   :  { %844 = vmatpush.msrb.mxu2 %v2642_v14  ;;  %864 = vmatpush.msrb.mxu3 %v2643_v15  ;;  %v2162_v14 = vld [vmem:[#allocation4 + $0x140] sm:$0xff]  ;;  %v2165_v15 = vld [vmem:[#allocation4 + $0x148] sm:$0xff] }
 0x1a5   :  { %805 = vmatpush.msrb.mxu0 %v2644_v16  ;;  %825 = vmatpush.msrb.mxu1 %v2645_v17  ;;  %v2168_v16 = vld [vmem:[#allocation4 + $0x150] sm:$0xff]  ;;  %v2171_v17 = vld [vmem:[#allocation4 + $0x158] sm:$0xff] }
 0x1a6   :  { %845 = vmatpush.msrb.mxu2 %v2646_v18  ;;  %865 = vmatpush.msrb.mxu3 %v2647_v19  ;;  %v2174_v18 = vld [vmem:[#allocation4 + $0x120] sm:$0xff]  ;;  %v2177_v19 = vld [vmem:[#allocation4 + $0x128] sm:$0xff] }
 0x1a7   :  { %806 = vmatpush.msrb.mxu0 %v2648_v21  ;;  %826 = vmatpush.msrb.mxu1 %v2649_v22  ;;  %v2180_v21 = vld [vmem:[#allocation4 + $0x130] sm:$0xff]  ;;  %v2183_v22 = vld [vmem:[#allocation4 + $0x138] sm:$0xff] }
 0x1a8   :  { %846 = vmatpush.msrb.mxu2 %v2650_v23  ;;  %866 = vmatpush.msrb.mxu3 %v2651_v24  ;;  %v2186_v23 = vld [vmem:[#allocation4 + $0x100] sm:$0xff]  ;;  %v2189_v24 = vld [vmem:[#allocation4 + $0x108] sm:$0xff] }
 0x1a9   :  { %807 = vmatpush.msrb.mxu0 %v2652_v25  ;;  %827 = vmatpush.msrb.mxu1 %v2653_v26  ;;  %v2192_v25 = vld [vmem:[#allocation4 + $0x110] sm:$0xff]  ;;  %v2195_v26 = vld [vmem:[#allocation4 + $0x118] sm:$0xff] }
 0x1aa   :  { %847 = vmatpush.msrb.mxu2 %v2654_v27  ;;  %867 = vmatpush.msrb.mxu3 %v2655_v28  ;;  %v2198_v27 = vld [vmem:[#allocation4 + $0xe0] sm:$0xff]  ;;  %v2201_v28 = vld [vmem:[#allocation4 + $0xe8] sm:$0xff] }
 0x206   :  { %v597_v29 = vpop.f32.mrf.mxu0  ;;  %v617_v30 = vpop.f32.mrf.mxu1 }
 0x207   :  { %v660_v32 = vadd.f32 %v597_v29, %v2656_v31  ;;  %v661_v35 = vadd.f32 %v617_v30, %v2657_v34  ;;  %v2204_v29 = vld [vmem:[#allocation4 + $0xf0] sm:$0xff]  ;;  %v2207_v30 = vld [vmem:[#allocation4 + $0xf8] sm:$0xff]  ;;  %v2210_v31 = vld [vmem:[#allocation4 + $0xc0] sm:$0xff] }
 0x208   :  { %v2216_v34 = vld [vmem:[#allocation4 + $0xd0] sm:$0xff] }
 0x209   :  { %v664_v36 = vmul.f32 0.5, %v660_v32  ;;  %v665_v37 = vmul.f32 0.5, %v661_v35  ;;  %v2213_v32 = vld [vmem:[#allocation4 + $0xc8] sm:$0xff]  ;;  %v2219_v35 = vld [vmem:[#allocation4 + $0xd8] sm:$0xff] }
 0x20b   :  { %1293 = vtanh.f32 %v664_v36  ;;  %v2222_v36 = vld [vmem:[#allocation4 + $0xa0] sm:$0xff] }
 0x20c   :  { %1295 = vtanh.f32 %v665_v37  ;;  %v2225_v37 = vld [vmem:[#allocation4 + $0xa8] sm:$0xff] }
 0x20d   :  { %v637_v38 = vpop.f32.mrf.mxu2  ;;  %v657_v39 = vpop.f32.mrf.mxu3 }
 0x20e   :  { %v662_v41 = vadd.f32 %v637_v38, %v2658_v40  ;;  %v663_v43 = vadd.f32 %v657_v39, %v2659_v42  ;;  %v2228_v38 = vld [vmem:[#allocation4 + $0xb0] sm:$0xff]  ;;  %v2231_v39 = vld [vmem:[#allocation4 + $0xb8] sm:$0xff]  ;;  %v2234_v40 = vld [vmem:[#allocation4 + $0x80] sm:$0xff] }
 0x20f   :  { %2660 = vst [vmem:[#allocation7_spill] sm:$0xff] %v2234_v40  ;;  %v2240_v42 = vld [vmem:[#allocation4 + $0x90] sm:$0xff] }
 0x210   :  { %v666_v44 = vmul.f32 0.5, %v662_v41  ;;  %1297 = vtanh.f32 %v663_v43  ;;  %v2237_v41 = vld [vmem:[#allocation4 + $0x88] sm:$0xff]  ;;  %2662 = vst [vmem:[#allocation10_spill] sm:$0xff] %v2240_v42  ;;  %v2243_v43 = vld [vmem:[#allocation4 + $0x98] sm:$0xff] }
 0x211   :  { %v1294_v45 = vpop.eup %1293  ;;  %2661 = vst [vmem:[#allocation8_spill] sm:$0xff] %v2237_v41 }
 0x212   :  { %v1296_v47 = vpop.eup %1295  ;;  %v670_v48 = vadd.f32 1.0, %v1294_v45  ;;  %1299 = vtanh.f32 %v666_v44  ;;  %2663 = vst [vmem:[#allocation9_spill] sm:$0xff] %v2243_v43  ;;  %v2246_v44 = vld [vmem:[#allocation4 + $0x60] sm:$0xff]  ;;  %v2249_v45 = vld [vmem:[#allocation4 + $0x68] sm:$0xff] }
 0x213   :  { %v671_v49 = vadd.f32 1.0, %v1296_v47  ;;  %2664 = vst [vmem:[#allocation31_spill] sm:$0xff] %v2246_v44  ;;  %v2252_v47 = vld [vmem:[#allocation4 + $0x70] sm:$0xff] }
 0x214   :  { %v673_v50 = vmul.f32 0.5, %v670_v48  ;;  %2665 = vst [vmem:[#allocation32_spill] sm:$0xff] %v2249_v45  ;;  %v2255_v48 = vld [vmem:[#allocation4 + $0x78] sm:$0xff] }
 0x215   :  { %v674_v6 = vmul.f32 0.5, %v671_v49  ;;  %2666 = vst [vmem:[#allocation33_spill] sm:$0xff] %v2252_v47  ;;  %v2258_v49 = vld [vmem:[#allocation4 + $0x40] sm:$0xff] }
 0x216   :  { %v1298_v62 = vpop.eup %1297  ;;  %2667 = vst [vmem:[#allocation34_spill] sm:$0xff] %v2255_v48 }
 0x217   :  { %v677_v55 = vmul.f32 %v674_v6, %v2027_v51  ;;  %v678_v1 = vmul.f32 %v1298_v62, %v673_v50  ;;  %v2129_v51 = vld [vmem:[#allocation4 + $0x1a8] sm:$0xff]  ;;  %2668 = vst [vmem:[#allocation11_spill] sm:$0xff] %v2258_v49  ;;  %v2264_v6 = vld [vmem:[#allocation4 + $0x50] sm:$0xff]  ;;  %v2267_v62 = vld [vmem:[#allocation4 + $0x58] sm:$0xff] }
 0x218   :  { %v1300_v3 = vpop.eup %1299  ;;  %v2261_v50 = vld [vmem:[#allocation4 + $0x48] sm:$0xff]  ;;  %2670 = vst [vmem:[#allocation14_spill] sm:$0xff] %v2264_v6 }
 0x219   :  { %v2099_v5 = vadd.f32 %v678_v1, %v677_v55  ;;  %v672_v20 = vadd.f32 1.0, %v1300_v3  ;;  %2669 = vst [vmem:[#allocation12_spill] sm:$0xff] %v2261_v50  ;;  %v2270_v55 = vld [vmem:[#allocation4 + $0x20] sm:$0xff]  ;;  %v2273_v1 = vld [vmem:[#allocation4 + $0x28] sm:$0xff]  ;;  %v2276_v3 = vld [vmem:[#allocation4 + $0x30] sm:$0xff] }
 0x21a   :  { %2671 = vst [vmem:[#allocation13_spill] sm:$0xff] %v2267_v62 }
 0x21b   :  { %1301 = vtanh.f32 %v2099_v5  ;;  %v675_v56 = vmul.f32 0.5, %v672_v20  ;;  %2672 = vst [vmem:[#allocation15_spill] sm:$0xff] %v2270_v55  ;;  %v2279_v20 = vld [vmem:[#allocation4 + $0x38] sm:$0xff] }
 0x21c   :  { %2673 = vst [vmem:[#allocation16_spill] sm:$0xff] %v2273_v1 }
 0x21d   :  { %2674 = vst [vmem:[#allocation18_spill] sm:$0xff] %v2276_v3 }
 0x21e   :  { %2675 = vst [vmem:[#allocation17_spill] sm:$0xff] %v2279_v20 }
 0x221   :  { %v1302_v53 = vpop.eup %1301 }
 0x222   :  { %v681_v57 = vmul.f32 %v1302_v53, %v675_v56  ;;  %v2282_v56 = vld [vmem:[#allocation4] sm:$0xff]  ;;  %v2285_v53 = vld [vmem:[#allocation4 + $0x8] sm:$0xff] }
 0x223   :  { %2676 = vst [vmem:[#allocation19_spill] sm:$0xff] %v2282_v56 }
 0x224   :  { %702 = vmatmul.f32.vlgmr.msra.gmra.mxu0 %v681_v57  ;;  %722 = vmatmul.f32.vlgmr.msra.gmra.mxu1 %v681_v57  ;;  %2677 = vst [vmem:[#allocation20_spill] sm:$0xff] %v2285_v53 }
 0x225   :  { %742 = vmatmul.f32.vlgmr.msra.gmra.mxu2 %v681_v57  ;;  %762 = vmatmul.f32.vlgmr.msra.gmra.mxu3 %v681_v57  ;;  %v2288_v57 = vld [vmem:[#allocation4 + $0x10] sm:$0xff] }
 0x226   :  { %898 = vmatpush.msra.mxu0 %v2102_v7  ;;  %918 = vmatpush.msra.mxu1 %v2105_v59  ;;  %2678 = vst [vmem:[#allocation22_spill] sm:$0xff] %v2288_v57 }
 0x227   :  { %938 = vmatpush.msra.mxu2 %v2108_v54  ;;  %958 = vmatpush.msra.mxu3 %v2111_v52 }
 0x228   :  { %899 = vmatpush.msra.mxu0 %v2114_v63  ;;  %919 = vmatpush.msra.mxu1 %v2117_v61 }
 0x229   :  { %939 = vmatpush.msra.mxu2 %v2120_v0  ;;  %959 = vmatpush.msra.mxu3 %v2123_v58 }
 0x22a   :  { %900 = vmatpush.msra.mxu0 %v2126_v2  ;;  %920 = vmatpush.msra.mxu1 %v2129_v51 }
 0x22b   :  { %940 = vmatpush.msra.mxu2 %v2132_v33  ;;  %960 = vmatpush.msra.mxu3 %v2135_v46 }
 0x22c   :  { %901 = vmatpush.msra.mxu0 %v2138_v4  ;;  %921 = vmatpush.msra.mxu1 %v2141_v60 }
 0x22d   :  { %941 = vmatpush.msra.mxu2 %v2144_v8  ;;  %961 = vmatpush.msra.mxu3 %v2147_v9 }
 0x22e   :  { %902 = vmatpush.msra.mxu0 %v2150_v10  ;;  %922 = vmatpush.msra.mxu1 %v2153_v11 }
 0x22f   :  { %942 = vmatpush.msra.mxu2 %v2156_v12  ;;  %962 = vmatpush.msra.mxu3 %v2159_v13 }
 0x230   :  { %903 = vmatpush.msra.mxu0 %v2162_v14  ;;  %923 = vmatpush.msra.mxu1 %v2165_v15 }
 0x231   :  { %943 = vmatpush.msra.mxu2 %v2168_v16  ;;  %963 = vmatpush.msra.mxu3 %v2171_v17 }
 0x232   :  { %904 = vmatpush.msra.mxu0 %v2174_v18  ;;  %924 = vmatpush.msra.mxu1 %v2177_v19 }
 0x233   :  { %944 = vmatpush.msra.mxu2 %v2180_v21  ;;  %964 = vmatpush.msra.mxu3 %v2183_v22 }
 0x234   :  { %905 = vmatpush.msra.mxu0 %v2186_v23  ;;  %925 = vmatpush.msra.mxu1 %v2189_v24 }
 0x235   :  { %945 = vmatpush.msra.mxu2 %v2192_v25  ;;  %965 = vmatpush.msra.mxu3 %v2195_v26 }
 0x236   :  { %906 = vmatpush.msra.mxu0 %v2198_v27  ;;  %926 = vmatpush.msra.mxu1 %v2201_v28 }
 0x237   :  { %946 = vmatpush.msra.mxu2 %v2204_v29  ;;  %966 = vmatpush.msra.mxu3 %v2207_v30 }
 0x238   :  { %907 = vmatpush.msra.mxu0 %v2210_v31  ;;  %927 = vmatpush.msra.mxu1 %v2213_v32 }
 0x239   :  { %947 = vmatpush.msra.mxu2 %v2216_v34  ;;  %967 = vmatpush.msra.mxu3 %v2219_v35 }
 0x23a   :  { %908 = vmatpush.msra.mxu0 %v2222_v36  ;;  %928 = vmatpush.msra.mxu1 %v2225_v37 }
 0x23b   :  { %948 = vmatpush.msra.mxu2 %v2228_v38  ;;  %968 = vmatpush.msra.mxu3 %v2231_v39 }
 0x23c   :  { %909 = vmatpush.msra.mxu0 %v2234_v40  ;;  %929 = vmatpush.msra.mxu1 %v2237_v41 }
 0x23d   :  { %949 = vmatpush.msra.mxu2 %v2240_v42  ;;  %969 = vmatpush.msra.mxu3 %v2243_v43 }
 0x23e   :  { %910 = vmatpush.msra.mxu0 %v2246_v44  ;;  %930 = vmatpush.msra.mxu1 %v2249_v45  ;;  %v2683_v44 = vld [vmem:[#allocation42_spill] sm:$0xff] }
 0x23f   :  { %950 = vmatpush.msra.mxu2 %v2252_v47  ;;  %970 = vmatpush.msra.mxu3 %v2255_v48  ;;  %v2682_v47 = vld [vmem:[#allocation41_spill] sm:$0xff] }
 0x240   :  { %911 = vmatpush.msra.mxu0 %v2258_v49  ;;  %931 = vmatpush.msra.mxu1 %v2261_v50 }
 0x241   :  { %951 = vmatpush.msra.mxu2 %v2264_v6  ;;  %971 = vmatpush.msra.mxu3 %v2267_v62  ;;  %v2680_v62 = vld [vmem:[#allocation39_spill] sm:$0xff]  ;;  %v2681_v6 = vld [vmem:[#allocation40_spill] sm:$0xff] }
 0x242   :  { %912 = vmatpush.msra.mxu0 %v2270_v55  ;;  %932 = vmatpush.msra.mxu1 %v2273_v1  ;;  %v2291_v1 = vld [vmem:[#allocation4 + $0x18] sm:$0xff] }
 0x243   :  { %952 = vmatpush.msra.mxu2 %v2276_v3  ;;  %972 = vmatpush.msra.mxu3 %v2279_v20  ;;  %2679 = vst [vmem:[#allocation21_spill] sm:$0xff] %v2291_v1 }
 0x244   :  { %913 = vmatpush.msra.mxu0 %v2282_v56  ;;  %933 = vmatpush.msra.mxu1 %v2285_v53 }
 0x245   :  { %953 = vmatpush.msra.mxu2 %v2288_v57  ;;  %973 = vmatpush.msra.mxu3 %v2291_v1 }
 0x2a1   :  { %v703_v3 = vpop.f32.mrf.mxu0  ;;  %v723_v55 = vpop.f32.mrf.mxu1 }
 0x2a2   :  { %v766_v20 = vadd.f32 %v703_v3, %v2680_v62  ;;  %v767_v50 = vadd.f32 %v723_v55, %v2681_v6 }
 0x2a4   :  { %v770_v49 = vmul.f32 0.5, %v766_v20  ;;  %v771_v56 = vmul.f32 0.5, %v767_v50 }
 0x2a6   :  { %1303 = vtanh.f32 %v770_v49 }
 0x2a7   :  { %1305 = vtanh.f32 %v771_v56  ;;  %v2690_v56 = vld [vmem:[#allocation33_spill] sm:$0xff] }
 0x2a8   :  { %v743_v48 = vpop.f32.mrf.mxu2  ;;  %v763_v53 = vpop.f32.mrf.mxu3 }
 0x2a9   :  { %v768_v45 = vadd.f32 %v743_v48, %v2682_v47  ;;  %v769_v57 = vadd.f32 %v763_v53, %v2683_v44  ;;  %v2691_v53 = vld [vmem:[#allocation34_spill] sm:$0xff] }
 0x2ab   :  { %v772_v43 = vmul.f32 0.5, %v768_v45  ;;  %1307 = vtanh.f32 %v769_v57  ;;  %v2692_v57 = vld [vmem:[#allocation11_spill] sm:$0xff] }
 0x2ac   :  { %v1304_v42 = vpop.eup %1303 }
 0x2ad   :  { %v1306_v1 = vpop.eup %1305  ;;  %v776_v41 = vadd.f32 1.0, %v1304_v42  ;;  %1309 = vtanh.f32 %v772_v43  ;;  %v2687_v42 = vld [vmem:[#allocation9_spill] sm:$0xff]  ;;  %v2688_v43 = vld [vmem:[#allocation31_spill] sm:$0xff] }
 0x2ae   :  { %v777_v40 = vadd.f32 1.0, %v1306_v1  ;;  %v2689_v1 = vld [vmem:[#allocation32_spill] sm:$0xff] }
 0x2af   :  { %v779_v62 = vmul.f32 0.5, %v776_v41  ;;  %v2686_v41 = vld [vmem:[#allocation10_spill] sm:$0xff] }
 0x2b0   :  { %v780_v3 = vmul.f32 0.5, %v777_v40  ;;  %v2685_v40 = vld [vmem:[#allocation8_spill] sm:$0xff] }
 0x2b1   :  { %v1308_v6 = vpop.eup %1307 }
 0x2b2   :  { %v783_v50 = vmul.f32 %v780_v3, %v2099_v5  ;;  %v784_v49 = vmul.f32 %v1308_v6, %v779_v62  ;;  %v2684_v5 = vld [vmem:[#allocation7_spill] sm:$0xff]  ;;  %v2693_v62 = vld [vmem:[#allocation12_spill] sm:$0xff]  ;;  %v2694_v3 = vld [vmem:[#allocation14_spill] sm:$0xff] }
 0x2b3   :  { %v1310_v55 = vpop.eup %1309  ;;  %v2695_v6 = vld [vmem:[#allocation13_spill] sm:$0xff] }
 0x2b4   :  { %v2299_v20 = vadd.f32 %v784_v49, %v783_v50  ;;  %v778_v47 = vadd.f32 1.0, %v1310_v55  ;;  %v2696_v50 = vld [vmem:[#allocation15_spill] sm:$0xff]  ;;  %v2697_v49 = vld [vmem:[#allocation16_spill] sm:$0xff]  ;;  %v2698_v55 = vld [vmem:[#allocation18_spill] sm:$0xff] }
 0x2b6   :  { %1311 = vtanh.f32 %v2299_v20  ;;  %v781_v44 = vmul.f32 0.5, %v778_v47  ;;  %v2699_v47 = vld [vmem:[#allocation17_spill] sm:$0xff] }
 0x2bc   :  { %v1312_v45 = vpop.eup %1311 }
 0x2bd   :  { %v787_v48 = vmul.f32 %v1312_v45, %v781_v44  ;;  %v2700_v44 = vld [vmem:[#allocation19_spill] sm:$0xff]  ;;  %v2701_v45 = vld [vmem:[#allocation20_spill] sm:$0xff] }
 0x2bf   :  { %808 = vmatmul.f32.vlgmr.msrb.gmra.mxu0 %v787_v48  ;;  %828 = vmatmul.f32.vlgmr.msrb.gmra.mxu1 %v787_v48 }
 0x2c0   :  { %848 = vmatmul.f32.vlgmr.msrb.gmra.mxu2 %v787_v48  ;;  %868 = vmatmul.f32.vlgmr.msrb.gmra.mxu3 %v787_v48  ;;  %v2702_v48 = vld [vmem:[#allocation22_spill] sm:$0xff] }
 0x2c1   :  { %1004 = vmatpush.msrb.mxu0 %v2102_v7  ;;  %1024 = vmatpush.msrb.mxu1 %v2105_v59 }
 0x2c2   :  { %1044 = vmatpush.msrb.mxu2 %v2108_v54  ;;  %1064 = vmatpush.msrb.mxu3 %v2111_v52 }
 0x2c3   :  { %1005 = vmatpush.msrb.mxu0 %v2114_v63  ;;  %1025 = vmatpush.msrb.mxu1 %v2117_v61 }
 0x2c4   :  { %1045 = vmatpush.msrb.mxu2 %v2120_v0  ;;  %1065 = vmatpush.msrb.mxu3 %v2123_v58 }
 0x2c5   :  { %1006 = vmatpush.msrb.mxu0 %v2126_v2  ;;  %1026 = vmatpush.msrb.mxu1 %v2129_v51 }
 0x2c6   :  { %1046 = vmatpush.msrb.mxu2 %v2132_v33  ;;  %1066 = vmatpush.msrb.mxu3 %v2135_v46 }
 0x2c7   :  { %1007 = vmatpush.msrb.mxu0 %v2138_v4  ;;  %1027 = vmatpush.msrb.mxu1 %v2141_v60 }
 0x2c8   :  { %1047 = vmatpush.msrb.mxu2 %v2144_v8  ;;  %1067 = vmatpush.msrb.mxu3 %v2147_v9 }
 0x2c9   :  { %1008 = vmatpush.msrb.mxu0 %v2150_v10  ;;  %1028 = vmatpush.msrb.mxu1 %v2153_v11 }
 0x2ca   :  { %1048 = vmatpush.msrb.mxu2 %v2156_v12  ;;  %1068 = vmatpush.msrb.mxu3 %v2159_v13 }
 0x2cb   :  { %1009 = vmatpush.msrb.mxu0 %v2162_v14  ;;  %1029 = vmatpush.msrb.mxu1 %v2165_v15 }
 0x2cc   :  { %1049 = vmatpush.msrb.mxu2 %v2168_v16  ;;  %1069 = vmatpush.msrb.mxu3 %v2171_v17 }
 0x2cd   :  { %1010 = vmatpush.msrb.mxu0 %v2174_v18  ;;  %1030 = vmatpush.msrb.mxu1 %v2177_v19 }
 0x2ce   :  { %1050 = vmatpush.msrb.mxu2 %v2180_v21  ;;  %1070 = vmatpush.msrb.mxu3 %v2183_v22 }
 0x2cf   :  { %1011 = vmatpush.msrb.mxu0 %v2186_v23  ;;  %1031 = vmatpush.msrb.mxu1 %v2189_v24 }
 0x2d0   :  { %1051 = vmatpush.msrb.mxu2 %v2192_v25  ;;  %1071 = vmatpush.msrb.mxu3 %v2195_v26 }
 0x2d1   :  { %1012 = vmatpush.msrb.mxu0 %v2198_v27  ;;  %1032 = vmatpush.msrb.mxu1 %v2201_v28 }
 0x2d2   :  { %1052 = vmatpush.msrb.mxu2 %v2204_v29  ;;  %1072 = vmatpush.msrb.mxu3 %v2207_v30 }
 0x2d3   :  { %1013 = vmatpush.msrb.mxu0 %v2210_v31  ;;  %1033 = vmatpush.msrb.mxu1 %v2213_v32 }
 0x2d4   :  { %1053 = vmatpush.msrb.mxu2 %v2216_v34  ;;  %1073 = vmatpush.msrb.mxu3 %v2219_v35 }
 0x2d5   :  { %1014 = vmatpush.msrb.mxu0 %v2222_v36  ;;  %1034 = vmatpush.msrb.mxu1 %v2225_v37 }
 0x2d6   :  { %1054 = vmatpush.msrb.mxu2 %v2228_v38  ;;  %1074 = vmatpush.msrb.mxu3 %v2231_v39 }
 0x2d7   :  { %1015 = vmatpush.msrb.mxu0 %v2684_v5  ;;  %1035 = vmatpush.msrb.mxu1 %v2685_v40 }
 0x2d8   :  { %1055 = vmatpush.msrb.mxu2 %v2686_v41  ;;  %1075 = vmatpush.msrb.mxu3 %v2687_v42  ;;  %v2707_v42 = vld [vmem:[#allocation46_spill] sm:$0xff] }
 0x2d9   :  { %1016 = vmatpush.msrb.mxu0 %v2688_v43  ;;  %1036 = vmatpush.msrb.mxu1 %v2689_v1  ;;  %v2706_v43 = vld [vmem:[#allocation45_spill] sm:$0xff] }
 0x2da   :  { %1056 = vmatpush.msrb.mxu2 %v2690_v56  ;;  %1076 = vmatpush.msrb.mxu3 %v2691_v53  ;;  %v2704_v53 = vld [vmem:[#allocation43_spill] sm:$0xff]  ;;  %v2705_v56 = vld [vmem:[#allocation44_spill] sm:$0xff] }
 0x2db   :  { %1017 = vmatpush.msrb.mxu0 %v2692_v57  ;;  %1037 = vmatpush.msrb.mxu1 %v2693_v62  ;;  %v2703_v57 = vld [vmem:[#allocation21_spill] sm:$0xff] }
 0x2dc   :  { %1057 = vmatpush.msrb.mxu2 %v2694_v3  ;;  %1077 = vmatpush.msrb.mxu3 %v2695_v6 }
 0x2dd   :  { %1018 = vmatpush.msrb.mxu0 %v2696_v50  ;;  %1038 = vmatpush.msrb.mxu1 %v2697_v49 }
 0x2de   :  { %1058 = vmatpush.msrb.mxu2 %v2698_v55  ;;  %1078 = vmatpush.msrb.mxu3 %v2699_v47 }
 0x2df   :  { %1019 = vmatpush.msrb.mxu0 %v2700_v44  ;;  %1039 = vmatpush.msrb.mxu1 %v2701_v45 }
 0x2e0   :  { %1059 = vmatpush.msrb.mxu2 %v2702_v48  ;;  %1079 = vmatpush.msrb.mxu3 %v2703_v57 }
 0x33c   :  { %v809_v62 = vpop.f32.mrf.mxu0  ;;  %v829_v3 = vpop.f32.mrf.mxu1 }
 0x33d   :  { %v872_v6 = vadd.f32 %v809_v62, %v2704_v53  ;;  %v873_v50 = vadd.f32 %v829_v3, %v2705_v56 }
 0x33f   :  { %v876_v1 = vmul.f32 0.5, %v872_v6  ;;  %v877_v49 = vmul.f32 0.5, %v873_v50 }
 0x341   :  { %1313 = vtanh.f32 %v876_v1 }
 0x342   :  { %1315 = vtanh.f32 %v877_v49 }
 0x343   :  { %v849_v55 = vpop.f32.mrf.mxu2  ;;  %v869_v47 = vpop.f32.mrf.mxu3 }
 0x344   :  { %v874_v44 = vadd.f32 %v849_v55, %v2706_v43  ;;  %v875_v45 = vadd.f32 %v869_v47, %v2707_v42 }
 0x346   :  { %v878_v41 = vmul.f32 0.5, %v874_v44  ;;  %1317 = vtanh.f32 %v875_v45 }
 0x347   :  { %v1314_v48 = vpop.eup %1313 }
 0x348   :  { %v1316_v57 = vpop.eup %1315  ;;  %v882_v40 = vadd.f32 1.0, %v1314_v48  ;;  %1319 = vtanh.f32 %v878_v41  ;;  %v2732_v48 = vld [vmem:[#allocation51_spill] sm:$0xff] }
 0x349   :  { %v883_v5 = vadd.f32 1.0, %v1316_v57 }
 0x34a   :  { %v885_v53 = vmul.f32 0.5, %v882_v40 }
 0x34b   :  { %v886_v62 = vmul.f32 0.5, %v883_v5 }
 0x34c   :  { %v1318_v56 = vpop.eup %1317 }
 0x34d   :  { %v889_v3 = vmul.f32 %v886_v62, %v2299_v20  ;;  %v890_v1 = vmul.f32 %v1318_v56, %v885_v53  ;;  %v2733_v62 = vld [vmem:[#allocation52_spill] sm:$0xff] }
 0x34e   :  { %v1320_v6 = vpop.eup %1319 }
 0x34f   :  { %v2371_v50 = vadd.f32 %v890_v1, %v889_v3  ;;  %v884_v43 = vadd.f32 1.0, %v1320_v6 }
 0x351   :  { %1321 = vtanh.f32 %v2371_v50  ;;  %v887_v42 = vmul.f32 0.5, %v884_v43  ;;  %v2734_v43 = vld [vmem:[#allocation53_spill] sm:$0xff] }
 0x357   :  { %v1322_v49 = vpop.eup %1321 }
 0x358   :  { %v893_v55 = vmul.f32 %v1322_v49, %v887_v42  ;;  %v2735_v49 = vld [vmem:[#allocation54_spill] sm:$0xff] }
 0x35a   :  { %914 = vmatmul.f32.vlgmr.msra.gmra.mxu0 %v893_v55  ;;  %934 = vmatmul.f32.vlgmr.msra.gmra.mxu1 %v893_v55 }
 0x35b   :  { %954 = vmatmul.f32.vlgmr.msra.gmra.mxu2 %v893_v55  ;;  %974 = vmatmul.f32.vlgmr.msra.gmra.mxu3 %v893_v55 }
 0x35c   :  { %1110 = vmatpush.msra.mxu0 %v2102_v7  ;;  %1130 = vmatpush.msra.mxu1 %v2105_v59  ;;  %v2708_v7 = vld [vmem:[#allocation7_spill] sm:$0xff]  ;;  %v2709_v59 = vld [vmem:[#allocation8_spill] sm:$0xff] }
 0x35d   :  { %1150 = vmatpush.msra.mxu2 %v2108_v54  ;;  %1170 = vmatpush.msra.mxu3 %v2111_v52  ;;  %v2710_v54 = vld [vmem:[#allocation10_spill] sm:$0xff]  ;;  %v2711_v52 = vld [vmem:[#allocation9_spill] sm:$0xff] }
 0x35e   :  { %1111 = vmatpush.msra.mxu0 %v2114_v63  ;;  %1131 = vmatpush.msra.mxu1 %v2117_v61  ;;  %v2712_v63 = vld [vmem:[#allocation31_spill] sm:$0xff]  ;;  %v2713_v61 = vld [vmem:[#allocation32_spill] sm:$0xff] }
 0x35f   :  { %1151 = vmatpush.msra.mxu2 %v2120_v0  ;;  %1171 = vmatpush.msra.mxu3 %v2123_v58  ;;  %v2714_v0 = vld [vmem:[#allocation33_spill] sm:$0xff]  ;;  %v2715_v58 = vld [vmem:[#allocation34_spill] sm:$0xff] }
 0x360   :  { %1112 = vmatpush.msra.mxu0 %v2126_v2  ;;  %1132 = vmatpush.msra.mxu1 %v2129_v51  ;;  %v2716_v2 = vld [vmem:[#allocation11_spill] sm:$0xff]  ;;  %v2717_v51 = vld [vmem:[#allocation12_spill] sm:$0xff] }
 0x361   :  { %1152 = vmatpush.msra.mxu2 %v2132_v33  ;;  %1172 = vmatpush.msra.mxu3 %v2135_v46  ;;  %v2718_v33 = vld [vmem:[#allocation14_spill] sm:$0xff]  ;;  %v2719_v46 = vld [vmem:[#allocation13_spill] sm:$0xff] }
 0x362   :  { %1113 = vmatpush.msra.mxu0 %v2138_v4  ;;  %1133 = vmatpush.msra.mxu1 %v2141_v60  ;;  %v2720_v4 = vld [vmem:[#allocation15_spill] sm:$0xff]  ;;  %v2721_v60 = vld [vmem:[#allocation16_spill] sm:$0xff] }
 0x363   :  { %1153 = vmatpush.msra.mxu2 %v2144_v8  ;;  %1173 = vmatpush.msra.mxu3 %v2147_v9  ;;  %v2722_v8 = vld [vmem:[#allocation18_spill] sm:$0xff]  ;;  %v2723_v9 = vld [vmem:[#allocation17_spill] sm:$0xff] }
 0x364   :  { %1114 = vmatpush.msra.mxu0 %v2150_v10  ;;  %1134 = vmatpush.msra.mxu1 %v2153_v11  ;;  %v2724_v10 = vld [vmem:[#allocation19_spill] sm:$0xff]  ;;  %v2725_v11 = vld [vmem:[#allocation20_spill] sm:$0xff] }
 0x365   :  { %1154 = vmatpush.msra.mxu2 %v2156_v12  ;;  %1174 = vmatpush.msra.mxu3 %v2159_v13  ;;  %v2726_v12 = vld [vmem:[#allocation22_spill] sm:$0xff]  ;;  %v2727_v13 = vld [vmem:[#allocation21_spill] sm:$0xff] }
 0x366   :  { %1115 = vmatpush.msra.mxu0 %v2162_v14  ;;  %1135 = vmatpush.msra.mxu1 %v2165_v15 }
 0x367   :  { %1155 = vmatpush.msra.mxu2 %v2168_v16  ;;  %1175 = vmatpush.msra.mxu3 %v2171_v17  ;;  %v2728_v16 = vld [vmem:[#allocation47_spill] sm:$0xff] }
 0x368   :  { %1116 = vmatpush.msra.mxu0 %v2174_v18  ;;  %1136 = vmatpush.msra.mxu1 %v2177_v19  ;;  %v2729_v18 = vld [vmem:[#allocation48_spill] sm:$0xff] }
 0x369   :  { %1156 = vmatpush.msra.mxu2 %v2180_v21  ;;  %1176 = vmatpush.msra.mxu3 %v2183_v22 }
 0x36a   :  { %1117 = vmatpush.msra.mxu0 %v2186_v23  ;;  %1137 = vmatpush.msra.mxu1 %v2189_v24 }
 0x36b   :  { %1157 = vmatpush.msra.mxu2 %v2192_v25  ;;  %1177 = vmatpush.msra.mxu3 %v2195_v26  ;;  %v2730_v25 = vld [vmem:[#allocation49_spill] sm:$0xff] }
 0x36c   :  { %1118 = vmatpush.msra.mxu0 %v2198_v27  ;;  %1138 = vmatpush.msra.mxu1 %v2201_v28  ;;  %v2731_v27 = vld [vmem:[#allocation50_spill] sm:$0xff] }
 0x36d   :  { %1158 = vmatpush.msra.mxu2 %v2204_v29  ;;  %1178 = vmatpush.msra.mxu3 %v2207_v30 }
 0x36e   :  { %1119 = vmatpush.msra.mxu0 %v2210_v31  ;;  %1139 = vmatpush.msra.mxu1 %v2213_v32 }
 0x36f   :  { %1159 = vmatpush.msra.mxu2 %v2216_v34  ;;  %1179 = vmatpush.msra.mxu3 %v2219_v35 }
 0x370   :  { %1120 = vmatpush.msra.mxu0 %v2222_v36  ;;  %1140 = vmatpush.msra.mxu1 %v2225_v37 }
 0x371   :  { %1160 = vmatpush.msra.mxu2 %v2228_v38  ;;  %1180 = vmatpush.msra.mxu3 %v2231_v39 }
 0x372   :  { %1121 = vmatpush.msra.mxu0 %v2708_v7  ;;  %1141 = vmatpush.msra.mxu1 %v2709_v59 }
 0x373   :  { %1161 = vmatpush.msra.mxu2 %v2710_v54  ;;  %1181 = vmatpush.msra.mxu3 %v2711_v52 }
 0x374   :  { %1122 = vmatpush.msra.mxu0 %v2712_v63  ;;  %1142 = vmatpush.msra.mxu1 %v2713_v61 }
 0x375   :  { %1162 = vmatpush.msra.mxu2 %v2714_v0  ;;  %1182 = vmatpush.msra.mxu3 %v2715_v58 }
 0x376   :  { %1123 = vmatpush.msra.mxu0 %v2716_v2  ;;  %1143 = vmatpush.msra.mxu1 %v2717_v51 }
 0x377   :  { %1163 = vmatpush.msra.mxu2 %v2718_v33  ;;  %1183 = vmatpush.msra.mxu3 %v2719_v46 }
 0x378   :  { %1124 = vmatpush.msra.mxu0 %v2720_v4  ;;  %1144 = vmatpush.msra.mxu1 %v2721_v60 }
 0x379   :  { %1164 = vmatpush.msra.mxu2 %v2722_v8  ;;  %1184 = vmatpush.msra.mxu3 %v2723_v9 }
 0x37a   :  { %1125 = vmatpush.msra.mxu0 %v2724_v10  ;;  %1145 = vmatpush.msra.mxu1 %v2725_v11 }
 0x37b   :  { %1165 = vmatpush.msra.mxu2 %v2726_v12  ;;  %1185 = vmatpush.msra.mxu3 %v2727_v13  ;;  %v2736_v12 = vld [vmem:[#allocation55_spill] sm:$0xff] }
 0x3d7   :  { %v915_v14 = vpop.f32.mrf.mxu0  ;;  %v935_v15 = vpop.f32.mrf.mxu1 }
 0x3d8   :  { %v978_v17 = vadd.f32 %v915_v14, %v2728_v16  ;;  %v979_v19 = vadd.f32 %v935_v15, %v2729_v18  ;;  %v2737_v14 = vld [vmem:[#allocation56_spill] sm:$0xff] }
 0x3da   :  { %v982_v21 = vmul.f32 0.5, %v978_v17  ;;  %v983_v22 = vmul.f32 0.5, %v979_v19 }
 0x3dc   :  { %1323 = vtanh.f32 %v982_v21  ;;  %v2738_v21 = vld [vmem:[#allocation57_spill] sm:$0xff] }
 0x3dd   :  { %1325 = vtanh.f32 %v983_v22 }
 0x3de   :  { %v955_v23 = vpop.f32.mrf.mxu2  ;;  %v975_v24 = vpop.f32.mrf.mxu3 }
 0x3df   :  { %v980_v26 = vadd.f32 %v955_v23, %v2730_v25  ;;  %v981_v28 = vadd.f32 %v975_v24, %v2731_v27  ;;  %v2739_v23 = vld [vmem:[#allocation58_spill] sm:$0xff] }
 0x3e1   :  { %v984_v29 = vmul.f32 0.5, %v980_v26  ;;  %1327 = vtanh.f32 %v981_v28 }
 0x3e2   :  { %v1324_v30 = vpop.eup %1323 }
 0x3e3   :  { %v1326_v31 = vpop.eup %1325  ;;  %v988_v32 = vadd.f32 1.0, %v1324_v30  ;;  %1329 = vtanh.f32 %v984_v29 }
 0x3e4   :  { %v989_v34 = vadd.f32 1.0, %v1326_v31 }
 0x3e5   :  { %v991_v35 = vmul.f32 0.5, %v988_v32 }
 0x3e6   :  { %v992_v36 = vmul.f32 0.5, %v989_v34 }
 0x3e7   :  { %v1328_v37 = vpop.eup %1327 }
 0x3e8   :  { %v995_v38 = vmul.f32 %v992_v36, %v2371_v50  ;;  %v996_v39 = vmul.f32 %v1328_v37, %v991_v35 }
 0x3e9   :  { %v1330_v20 = vpop.eup %1329 }
 0x3ea   :  { %v997_v5 = vadd.f32 %v996_v39, %v995_v38  ;;  %v990_v40 = vadd.f32 1.0, %v1330_v20  ;;  %v1271_v20 = vld [vmem:[%s2461_s4] ss:$0 sm:$0xff] }
 0x3ec   :  { %1331 = vtanh.f32 %v997_v5  ;;  %v993_v41 = vmul.f32 0.5, %v990_v40 }
 0x3f2   :  { %v1332_v57 = vpop.eup %1331 }
 0x3f3   :  { %v999_v47 = vmul.f32 %v1332_v57, %v993_v41  ;;  %v1272_v57 = vld [vmem:[#allocation3] ss:$0 sm:$0xff] }
 0x3f5   :  { %1020 = vmatmul.f32.vlgmr.msrb.gmra.mxu0 %v999_v47  ;;  %1040 = vmatmul.f32.vlgmr.msrb.gmra.mxu1 %v999_v47 }
 0x3f6   :  { %1060 = vmatmul.f32.vlgmr.msrb.gmra.mxu2 %v999_v47  ;;  %1080 = vmatmul.f32.vlgmr.msrb.gmra.mxu3 %v999_v47 }
 0x472   :  { %v1021_v44 = vpop.f32.mrf.mxu0  ;;  %v1041_v45 = vpop.f32.mrf.mxu1 }
 0x473   :  { %v1084_v53 = vadd.f32 %v1021_v44, %v2732_v48  ;;  %v1085_v56 = vadd.f32 %v1041_v45, %v2733_v62 }
 0x475   :  { %v1088_v3 = vmul.f32 0.5, %v1084_v53  ;;  %v1089_v1 = vmul.f32 0.5, %v1085_v56 }
 0x477   :  { %1333 = vtanh.f32 %v1088_v3 }
 0x478   :  { %1335 = vtanh.f32 %v1089_v1 }
 0x479   :  { %v1061_v6 = vpop.f32.mrf.mxu2  ;;  %v1081_v50 = vpop.f32.mrf.mxu3 }
 0x47a   :  { %v1086_v42 = vadd.f32 %v1061_v6, %v2734_v43  ;;  %v1087_v55 = vadd.f32 %v1081_v50, %v2735_v49 }
 0x47c   :  { %v1090_v7 = vmul.f32 0.5, %v1086_v42  ;;  %1337 = vtanh.f32 %v1087_v55 }
 0x47d   :  { %v1334_v59 = vpop.eup %1333 }
 0x47e   :  { %v1336_v54 = vpop.eup %1335  ;;  %v1094_v52 = vadd.f32 1.0, %v1334_v59  ;;  %1339 = vtanh.f32 %v1090_v7 }
 0x47f   :  { %v1095_v63 = vadd.f32 1.0, %v1336_v54 }
 0x480   :  { %v1097_v61 = vmul.f32 0.5, %v1094_v52 }
 0x481   :  { %v1098_v0 = vmul.f32 0.5, %v1095_v63 }
 0x482   :  { %v1338_v58 = vpop.eup %1337 }
 0x483   :  { %v1101_v2 = vmul.f32 %v1098_v0, %v997_v5  ;;  %v1102_v51 = vmul.f32 %v1338_v58, %v1097_v61 }
 0x484   :  { %v1340_v33 = vpop.eup %1339 }
 0x485   :  { %v1103_v46 = vadd.f32 %v1102_v51, %v1101_v2  ;;  %v1096_v4 = vadd.f32 1.0, %v1340_v33 }
 0x487   :  { %1341 = vtanh.f32 %v1103_v46  ;;  %v1099_v60 = vmul.f32 0.5, %v1096_v4 }
 0x48d   :  { %v1342_v8 = vpop.eup %1341 }
 0x48e   :  { %v1105_v9 = vmul.f32 %v1342_v8, %v1099_v60 }
 0x490   :  { %1126 = vmatmul.f32.vlgmr.msra.gmra.mxu0 %v1105_v9  ;;  %1146 = vmatmul.f32.vlgmr.msra.gmra.mxu1 %v1105_v9 }
 0x491   :  { %1166 = vmatmul.f32.vlgmr.msra.gmra.mxu2 %v1105_v9  ;;  %1186 = vmatmul.f32.vlgmr.msra.gmra.mxu3 %v1105_v9 }
 0x50d   :  { %v1127_v10 = vpop.f32.mrf.mxu0  ;;  %v1147_v11 = vpop.f32.mrf.mxu1 }
 0x50e   :  { %v1190_v13 = vadd.f32 %v1127_v10, %v2736_v12  ;;  %v1191_v15 = vadd.f32 %v1147_v11, %v2737_v14 }
 0x510   :  { %v1194_v16 = vmul.f32 0.5, %v1190_v13  ;;  %v1195_v17 = vmul.f32 0.5, %v1191_v15 }
 0x512   :  { %1343 = vtanh.f32 %v1194_v16 }
 0x513   :  { %1345 = vtanh.f32 %v1195_v17 }
 0x514   :  { %v1167_v18 = vpop.f32.mrf.mxu2  ;;  %v1187_v19 = vpop.f32.mrf.mxu3 }
 0x515   :  { %v1192_v22 = vadd.f32 %v1167_v18, %v2738_v21  ;;  %v1193_v24 = vadd.f32 %v1187_v19, %v2739_v23 }
 0x517   :  { %v1196_v25 = vmul.f32 0.5, %v1192_v22  ;;  %1347 = vtanh.f32 %v1193_v24 }
 0x518   :  { %v1344_v26 = vpop.eup %1343 }
 0x519   :  { %v1346_v27 = vpop.eup %1345  ;;  %v1200_v28 = vadd.f32 1.0, %v1344_v26  ;;  %1349 = vtanh.f32 %v1196_v25 }
 0x51a   :  { %v1201_v29 = vadd.f32 1.0, %v1346_v27 }
 0x51b   :  { %v1203_v30 = vmul.f32 0.5, %v1200_v28 }
 0x51c   :  { %v1204_v31 = vmul.f32 0.5, %v1201_v29 }
 0x51d   :  { %v1348_v32 = vpop.eup %1347 }
 0x51e   :  { %v1207_v34 = vmul.f32 %v1204_v31, %v1103_v46  ;;  %v1208_v35 = vmul.f32 %v1348_v32, %v1203_v30 }
 0x51f   :  { %v1350_v36 = vpop.eup %1349 }
 0x520   :  { %v1209_v37 = vadd.f32 %v1208_v35, %v1207_v34  ;;  %v1202_v38 = vadd.f32 1.0, %v1350_v36 }
 0x522   :  { %1351 = vtanh.f32 %v1209_v37  ;;  %v1205_v39 = vmul.f32 0.5, %v1202_v38 }
 0x528   :  { %v1352_v5 = vpop.eup %1351 }
 0x529   :  { %v1211_v40 = vmul.f32 %v1352_v5, %v1205_v39 }
 0x52b   :  { %v1216_v41 = vmul.f32 %v1271_v20, %v1211_v40 }
 0x52d   :  { %1217 = vadd.xlane.f32.xlu0 %v1216_v41 }
 0x5a0   :  { %v1218_v47 = vpop.xlane.xlu0 %1217 }
 0x5a1   :  { %v1223_v44 = vadd.f32 %v1272_v57, %v1218_v47 }
 0x5a3   :  { %1225 = vst.msk [vmem:[%s2463_s6] sm:$0xff] %vm1224_vm2, %v1223_v44 }
 0x5a4   :  { %1230 = vsyncpa [#allocation5], 1 }

</bundles_post_ra>
